<compile_context>
chip_gen: v6e
topology: v6e:2x2x1
jax: 0.10.0
libtpu: 0.0.40
codegen_flags: <defaults>
</compile_context>

<pallas_src>
import functools

import numpy as np
import jax
import jax.numpy as jnp
from jax.experimental import pallas as pl
from jax.experimental.pallas import tpu as pltpu

LEAKY_SLOPE = 0.1
BN_EPS = 1e-5  # nn.BatchNorm2d default eps


# ----------------------------------------------------------------------------
# Fused Conv2d + (folded BN) bias + LeakyReLU kernel
# ----------------------------------------------------------------------------
def _fused_conv_kernel(x_ref, w_ref, b_ref, o_ref, *,
                       kh, kw, s, th, wo, cin, cout, apply_act, slope):
    """One (batch, output-row-tile) grid step.

    x_ref: (s*s, Hs, Ws, Cin) bf16 — phase-decomposed, spatially padded input for
           the current batch image (VMEM-resident across all row tiles).
    w_ref: (kh*kw, Cin, Cout) bf16 — BN-folded weights, one (Cin, Cout) slab / tap.
    b_ref: (1, Cout)          f32  — BN-folded bias.
    o_ref: (1, th, wo, Cout)  f32  — output row tile (full-extent Wo / Cout block).
    """
    i = pl.program_id(1)
    r0 = i * th  # first output row of this tile

    acc = jnp.zeros((th * wo, cout), jnp.float32)
    # Unrolled tap loop: fused "in-VMEM im2col" + MXU dot, f32 register accumulation.
    for di in range(kh):
        qi, ri = di // s, di % s
        for dj in range(kw):
            qj, rj = dj // s, dj % s
            # output (y, x) for tap (di, dj) reads padded input (y*s+di, x*s+dj)
            #   == phase (ri, rj) at contiguous offsets (y+qi, x+qj)
            patch = x_ref[ri * s + rj, pl.ds(r0 + qi, th), pl.ds(qj, wo), :]
            patch = patch.reshape(th * wo, cin)
            acc = acc + jnp.dot(patch, w_ref[di * kw + dj],
                                preferred_element_type=jnp.float32)

    y = acc + b_ref[...]  # (1, Cout) broadcasts over the th*wo rows
    if apply_act:
        y = jnp.where(y >= 0, y, y * slope)  # LeakyReLU(0.1)
    o_ref[...] = y.reshape(1, th, wo, cout).astype(o_ref.dtype)


def conv_bn_act(x_nchw, weight, bn_gamma, bn_beta, bn_mean, bn_var,
                stride=1, act=True, eps=BN_EPS, row_tile=None):
    """Conv.forward (eval): LeakyReLU(BN(Conv2d(x))), groups=1, padding=k//2.

    x_nchw : (N, Cin, H, W) f32      (PyTorch layout)
    weight : (Cout, Cin, kh, kw) f32 (PyTorch layout, bias=False)
    returns: (N, Cout, Ho, Wo) f32   (PyTorch layout)
    """
    nb, cin, h, w = x_nchw.shape
    cout, cin_w, kh, kw = weight.shape
    assert cin_w == cin, "grouped conv (g>1) not supported"  # TODO(synk): g > 1
    s = int(stride)
    p = kh // 2  # the module always uses padding = k // 2

    # ---- fold eval-mode BatchNorm into the conv weights / bias (exact) ----
    scale = bn_gamma / jnp.sqrt(bn_var + eps)            # (Cout,)
    shift = bn_beta - bn_mean * scale                    # (Cout,)
    w_t = jnp.transpose(weight, (2, 3, 1, 0)) * scale    # (kh, kw, Cin, Cout), f32 fold
    w_t = w_t.reshape(kh * kw, cin, cout).astype(jnp.bfloat16)
    bias = shift.reshape(1, cout).astype(jnp.float32)

    ho = (h + 2 * p - kh) // s + 1
    wo = (w + 2 * p - kw) // s + 1

    # ---- NCHW -> NHWC (C on lanes), spatial zero pad (== conv padding), bf16 ----
    xh = jnp.transpose(x_nchw, (0, 2, 3, 1)).astype(jnp.bfloat16)
    hp, wp = h + 2 * p, w + 2 * p
    hp_up = -(-hp // s) * s   # round up to a multiple of s (padded rows never read)
    wp_up = -(-wp // s) * s
    xh = jnp.pad(xh, ((0, 0), (p, hp_up - hp + p), (p, wp_up - wp + p), (0, 0)))
    hs, ws = hp_up // s, wp_up // s

    # Phase (space-to-batch) decomposition: x_phase[n, ri*s+rj, a, b, c]
    #   == x_padded[n, a*s+ri, b*s+rj, c]; makes every in-kernel read contiguous.
    if s == 1:
        xph = xh                                               # (N, Hp, Wp, Cin)
    else:
        xph = xh.reshape(nb, hs, s, ws, s, cin)
        xph = xph.transpose(0, 2, 4, 1, 3, 5).reshape(nb * s * s, hs, ws, cin)

    # ---- output-row tile: largest divisor of Ho keeping the matmul M <= 512 ----
    if row_tile is None:
        th = ho
        for d in range(ho, 0, -1):
            if ho % d == 0 and d * wo <= 512:
                th = d
                break
    else:
        th = int(row_tile)
    assert ho % th == 0
    n_tiles = ho // th

    kernel = functools.partial(
        _fused_conv_kernel, kh=kh, kw=kw, s=s, th=th, wo=wo, cin=cin, cout=cout,
        apply_act=bool(act), slope=LEAKY_SLOPE)

    out_nhwc = pl.pallas_call(
        kernel,
        out_shape=jax.ShapeDtypeStruct((nb, ho, wo, cout), jnp.float32),
        grid_spec=pltpu.PrefetchScalarGridSpec(
            num_scalar_prefetch=0,
            grid=(nb, n_tiles),
            in_specs=[
                # whole (phase-decomposed) image of batch b; constant along the
                # row-tile axis -> stays resident in VMEM, no re-DMA per tile.
                pl.BlockSpec((s * s, hs, ws, cin), lambda b, i: (b, 0, 0, 0)),
                pl.BlockSpec((kh * kw, cin, cout), lambda b, i: (0, 0, 0)),
                pl.BlockSpec((1, cout), lambda b, i: (0, 0)),
            ],
            out_specs=pl.BlockSpec((1, th, wo, cout), lambda b, i: (b, i, 0, 0)),
        ),
        compiler_params=pltpu.CompilerParams(
            dimension_semantics=("parallel", "parallel"),
            vmem_limit_bytes=32 * 1024 * 1024,
        ),
    )(xph, w_t, bias)

    # back to PyTorch NCHW output layout
    return jnp.transpose(out_nhwc, (0, 3, 1, 2))


# ----------------------------------------------------------------------------
# Pure-XLA reference (same bf16-rounded operands, f32 math) for self-checking
# ----------------------------------------------------------------------------
def conv_bn_act_reference(x_nchw, weight, bn_gamma, bn_beta, bn_mean, bn_var,
                          stride=1, act=True, eps=BN_EPS):
    scale = bn_gamma / jnp.sqrt(bn_var + eps)
    shift = bn_beta - bn_mean * scale
    k = weight.shape[2]
    p = k // 2
    w_f = (jnp.transpose(weight, (2, 3, 1, 0)) * scale).astype(jnp.bfloat16)
    w_f = w_f.astype(jnp.float32)
    x_f = jnp.transpose(x_nchw, (0, 2, 3, 1)).astype(jnp.bfloat16).astype(jnp.float32)
    y = jax.lax.conv_general_dilated(
        x_f, w_f, window_strides=(stride, stride), padding=[(p, p), (p, p)],
        dimension_numbers=('NHWC', 'HWIO', 'NHWC'),
        precision=jax.lax.Precision.HIGHEST)
    y = y + shift
    if act:
        y = jnp.where(y >= 0, y, y * LEAKY_SLOPE)
    return jnp.transpose(y, (0, 3, 1, 2))


# ----------------------------------------------------------------------------
# Demo / self-test
# ----------------------------------------------------------------------------
if __name__ == "__main__":
    key = jax.random.PRNGKey(0)
    N, H, W = 2, 16, 16
    #            c1, c2, k, s, act, explicit row_tile (exercises the 2-tile grid)
    configs = [(8, 32, 3, 1, True, 8),
               (8, 32, 1, 1, True, None),
               (4, 16, 3, 2, False, None)]

    for (c1, c2, k, s, act, rt) in configs:
        key, kx, kwt, kg, kb, km, kv = jax.random.split(key, 7)
        x = jax.random.normal(kx, (N, c1, H, W), jnp.float32)
        wgt = jax.random.normal(kwt, (c2, c1, k, k), jnp.float32) / np.sqrt(c1 * k * k)
        gamma = 1.0 + 0.1 * jax.random.normal(kg, (c2,), jnp.float32)
        beta = 0.1 * jax.random.normal(kb, (c2,), jnp.float32)
        mean = 0.1 * jax.random.normal(km, (c2,), jnp.float32)
        var = 1.0 + 0.1 * jnp.abs(jax.random.normal(kv, (c2,), jnp.float32))

        fwd = jax.jit(functools.partial(conv_bn_act, stride=s, act=act, row_tile=rt))
        out = jax.block_until_ready(fwd(x, wgt, gamma, beta, mean, var))

        p = k // 2
        ho = (H + 2 * p - k) // s + 1
        wo = (W + 2 * p - k) // s + 1
        assert out.shape == (N, c2, ho, wo), out.shape
        assert bool(jnp.all(jnp.isfinite(out)))

        ref = conv_bn_act_reference(x, wgt, gamma, beta, mean, var, stride=s, act=act)
        err = float(jnp.max(jnp.abs(out - ref)))
        assert err < 5e-3, f"mismatch vs reference: {err}"

    print("KERNEL_OK")
</pallas_src>

<mosaic_0001>
module attributes {stable_mosaic.version = 11 : i64} {
  func.func @_fused_conv_kernel(%arg0: i32, %arg1: i32, %arg2: memref<1x18x18x8xbf16, #tpu.memory_space<vmem>>, %arg3: memref<9x8x32xbf16, #tpu.memory_space<vmem>>, %arg4: memref<1x32xf32, #tpu.memory_space<vmem>>, %arg5: memref<1x8x16x32xf32, #tpu.memory_space<vmem>>) attributes {dimension_semantics = [#tpu.dimension_semantics<parallel>, #tpu.dimension_semantics<parallel>], iteration_bounds = array<i64: 2, 2>, scalar_prefetch = 0 : i64, scratch_operands = 0 : i64, tpu.core_type = #tpu.core_type<tc>, window_params = [{transform_indices = @transform_0, window_bounds = array<i64: 1, 18, 18, 8>}, {pipeline_mode = #tpu.pipeline_mode<synchronous>, transform_indices = @transform_1, window_bounds = array<i64: 9, 8, 32>}, {pipeline_mode = #tpu.pipeline_mode<synchronous>, transform_indices = @transform_2, window_bounds = array<i64: 1, 32>}, {transform_indices = @transform_3, window_bounds = array<i64: 1, 8, 16, 32>}]} {
    %c8_i32 = arith.constant 8 : i32
    %0 = arith.muli %arg1, %c8_i32 : i32
    %cst = arith.constant 0.000000e+00 : f32
    %1 = vector.broadcast %cst : f32 to vector<128x32xf32>
    %c0_i32 = arith.constant 0 : i32
    %2 = arith.addi %0, %c0_i32 : i32
    %c0 = arith.constant 0 : index
    %3 = arith.index_cast %2 : i32 to index
    %c0_0 = arith.constant 0 : index
    %c0_1 = arith.constant 0 : index
    %4 = vector.load %arg2[%c0, %3, %c0_0, %c0_1] : memref<1x18x18x8xbf16, #tpu.memory_space<vmem>>, vector<1x8x16x8xbf16>
    %5 = vector.shape_cast %4 : vector<1x8x16x8xbf16> to vector<8x16x8xbf16>
    %6 = vector.shape_cast %5 : vector<8x16x8xbf16> to vector<128x8xbf16>
    %c0_2 = arith.constant 0 : index
    %c0_3 = arith.constant 0 : index
    %c0_4 = arith.constant 0 : index
    %7 = vector.load %arg3[%c0_2, %c0_3, %c0_4] : memref<9x8x32xbf16, #tpu.memory_space<vmem>>, vector<1x8x32xbf16>
    %8 = vector.shape_cast %7 : vector<1x8x32xbf16> to vector<8x32xbf16>
    %cst_5 = arith.constant dense<0.000000e+00> : vector<128x32xf32>
    %9 = tpu.matmul %6, %8, %cst_5 {dimension_numbers = #tpu.dot_dimension_numbers<[1], [0], [0], [1], [0, 0, 1, 1], [], []>} : vector<128x8xbf16>, vector<8x32xbf16>, vector<128x32xf32> -> vector<128x32xf32>
    %10 = arith.addf %1, %9 : vector<128x32xf32>
    %c0_i32_6 = arith.constant 0 : i32
    %11 = arith.addi %0, %c0_i32_6 : i32
    %c0_7 = arith.constant 0 : index
    %12 = arith.index_cast %11 : i32 to index
    %c1 = arith.constant 1 : index
    %c0_8 = arith.constant 0 : index
    %13 = vector.load %arg2[%c0_7, %12, %c1, %c0_8] : memref<1x18x18x8xbf16, #tpu.memory_space<vmem>>, vector<1x8x16x8xbf16>
    %14 = vector.shape_cast %13 : vector<1x8x16x8xbf16> to vector<8x16x8xbf16>
    %15 = vector.shape_cast %14 : vector<8x16x8xbf16> to vector<128x8xbf16>
    %c1_9 = arith.constant 1 : index
    %c0_10 = arith.constant 0 : index
    %c0_11 = arith.constant 0 : index
    %16 = vector.load %arg3[%c1_9, %c0_10, %c0_11] : memref<9x8x32xbf16, #tpu.memory_space<vmem>>, vector<1x8x32xbf16>
    %17 = vector.shape_cast %16 : vector<1x8x32xbf16> to vector<8x32xbf16>
    %cst_12 = arith.constant dense<0.000000e+00> : vector<128x32xf32>
    %18 = tpu.matmul %15, %17, %cst_12 {dimension_numbers = #tpu.dot_dimension_numbers<[1], [0], [0], [1], [0, 0, 1, 1], [], []>} : vector<128x8xbf16>, vector<8x32xbf16>, vector<128x32xf32> -> vector<128x32xf32>
    %19 = arith.addf %10, %18 : vector<128x32xf32>
    %c0_i32_13 = arith.constant 0 : i32
    %20 = arith.addi %0, %c0_i32_13 : i32
    %c0_14 = arith.constant 0 : index
    %21 = arith.index_cast %20 : i32 to index
    %c2 = arith.constant 2 : index
    %c0_15 = arith.constant 0 : index
    %22 = vector.load %arg2[%c0_14, %21, %c2, %c0_15] : memref<1x18x18x8xbf16, #tpu.memory_space<vmem>>, vector<1x8x16x8xbf16>
    %23 = vector.shape_cast %22 : vector<1x8x16x8xbf16> to vector<8x16x8xbf16>
    %24 = vector.shape_cast %23 : vector<8x16x8xbf16> to vector<128x8xbf16>
    %c2_16 = arith.constant 2 : index
    %c0_17 = arith.constant 0 : index
    %c0_18 = arith.constant 0 : index
    %25 = vector.load %arg3[%c2_16, %c0_17, %c0_18] : memref<9x8x32xbf16, #tpu.memory_space<vmem>>, vector<1x8x32xbf16>
    %26 = vector.shape_cast %25 : vector<1x8x32xbf16> to vector<8x32xbf16>
    %cst_19 = arith.constant dense<0.000000e+00> : vector<128x32xf32>
    %27 = tpu.matmul %24, %26, %cst_19 {dimension_numbers = #tpu.dot_dimension_numbers<[1], [0], [0], [1], [0, 0, 1, 1], [], []>} : vector<128x8xbf16>, vector<8x32xbf16>, vector<128x32xf32> -> vector<128x32xf32>
    %28 = arith.addf %19, %27 : vector<128x32xf32>
    %c1_i32 = arith.constant 1 : i32
    %29 = arith.addi %0, %c1_i32 : i32
    %c0_20 = arith.constant 0 : index
    %30 = arith.index_cast %29 : i32 to index
    %c0_21 = arith.constant 0 : index
    %c0_22 = arith.constant 0 : index
    %31 = vector.load %arg2[%c0_20, %30, %c0_21, %c0_22] : memref<1x18x18x8xbf16, #tpu.memory_space<vmem>>, vector<1x8x16x8xbf16>
    %32 = vector.shape_cast %31 : vector<1x8x16x8xbf16> to vector<8x16x8xbf16>
    %33 = vector.shape_cast %32 : vector<8x16x8xbf16> to vector<128x8xbf16>
    %c3 = arith.constant 3 : index
    %c0_23 = arith.constant 0 : index
    %c0_24 = arith.constant 0 : index
    %34 = vector.load %arg3[%c3, %c0_23, %c0_24] : memref<9x8x32xbf16, #tpu.memory_space<vmem>>, vector<1x8x32xbf16>
    %35 = vector.shape_cast %34 : vector<1x8x32xbf16> to vector<8x32xbf16>
    %cst_25 = arith.constant dense<0.000000e+00> : vector<128x32xf32>
    %36 = tpu.matmul %33, %35, %cst_25 {dimension_numbers = #tpu.dot_dimension_numbers<[1], [0], [0], [1], [0, 0, 1, 1], [], []>} : vector<128x8xbf16>, vector<8x32xbf16>, vector<128x32xf32> -> vector<128x32xf32>
    %37 = arith.addf %28, %36 : vector<128x32xf32>
    %c1_i32_26 = arith.constant 1 : i32
    %38 = arith.addi %0, %c1_i32_26 : i32
    %c0_27 = arith.constant 0 : index
    %39 = arith.index_cast %38 : i32 to index
    %c1_28 = arith.constant 1 : index
    %c0_29 = arith.constant 0 : index
    %40 = vector.load %arg2[%c0_27, %39, %c1_28, %c0_29] : memref<1x18x18x8xbf16, #tpu.memory_space<vmem>>, vector<1x8x16x8xbf16>
    %41 = vector.shape_cast %40 : vector<1x8x16x8xbf16> to vector<8x16x8xbf16>
    %42 = vector.shape_cast %41 : vector<8x16x8xbf16> to vector<128x8xbf16>
    %c4 = arith.constant 4 : index
    %c0_30 = arith.constant 0 : index
    %c0_31 = arith.constant 0 : index
    %43 = vector.load %arg3[%c4, %c0_30, %c0_31] : memref<9x8x32xbf16, #tpu.memory_space<vmem>>, vector<1x8x32xbf16>
    %44 = vector.shape_cast %43 : vector<1x8x32xbf16> to vector<8x32xbf16>
    %cst_32 = arith.constant dense<0.000000e+00> : vector<128x32xf32>
    %45 = tpu.matmul %42, %44, %cst_32 {dimension_numbers = #tpu.dot_dimension_numbers<[1], [0], [0], [1], [0, 0, 1, 1], [], []>} : vector<128x8xbf16>, vector<8x32xbf16>, vector<128x32xf32> -> vector<128x32xf32>
    %46 = arith.addf %37, %45 : vector<128x32xf32>
    %c1_i32_33 = arith.constant 1 : i32
    %47 = arith.addi %0, %c1_i32_33 : i32
    %c0_34 = arith.constant 0 : index
    %48 = arith.index_cast %47 : i32 to index
    %c2_35 = arith.constant 2 : index
    %c0_36 = arith.constant 0 : index
    %49 = vector.load %arg2[%c0_34, %48, %c2_35, %c0_36] : memref<1x18x18x8xbf16, #tpu.memory_space<vmem>>, vector<1x8x16x8xbf16>
    %50 = vector.shape_cast %49 : vector<1x8x16x8xbf16> to vector<8x16x8xbf16>
    %51 = vector.shape_cast %50 : vector<8x16x8xbf16> to vector<128x8xbf16>
    %c5 = arith.constant 5 : index
    %c0_37 = arith.constant 0 : index
    %c0_38 = arith.constant 0 : index
    %52 = vector.load %arg3[%c5, %c0_37, %c0_38] : memref<9x8x32xbf16, #tpu.memory_space<vmem>>, vector<1x8x32xbf16>
    %53 = vector.shape_cast %52 : vector<1x8x32xbf16> to vector<8x32xbf16>
    %cst_39 = arith.constant dense<0.000000e+00> : vector<128x32xf32>
    %54 = tpu.matmul %51, %53, %cst_39 {dimension_numbers = #tpu.dot_dimension_numbers<[1], [0], [0], [1], [0, 0, 1, 1], [], []>} : vector<128x8xbf16>, vector<8x32xbf16>, vector<128x32xf32> -> vector<128x32xf32>
    %55 = arith.addf %46, %54 : vector<128x32xf32>
    %c2_i32 = arith.constant 2 : i32
    %56 = arith.addi %0, %c2_i32 : i32
    %c0_40 = arith.constant 0 : index
    %57 = arith.index_cast %56 : i32 to index
    %c0_41 = arith.constant 0 : index
    %c0_42 = arith.constant 0 : index
    %58 = vector.load %arg2[%c0_40, %57, %c0_41, %c0_42] : memref<1x18x18x8xbf16, #tpu.memory_space<vmem>>, vector<1x8x16x8xbf16>
    %59 = vector.shape_cast %58 : vector<1x8x16x8xbf16> to vector<8x16x8xbf16>
    %60 = vector.shape_cast %59 : vector<8x16x8xbf16> to vector<128x8xbf16>
    %c6 = arith.constant 6 : index
    %c0_43 = arith.constant 0 : index
    %c0_44 = arith.constant 0 : index
    %61 = vector.load %arg3[%c6, %c0_43, %c0_44] : memref<9x8x32xbf16, #tpu.memory_space<vmem>>, vector<1x8x32xbf16>
    %62 = vector.shape_cast %61 : vector<1x8x32xbf16> to vector<8x32xbf16>
    %cst_45 = arith.constant dense<0.000000e+00> : vector<128x32xf32>
    %63 = tpu.matmul %60, %62, %cst_45 {dimension_numbers = #tpu.dot_dimension_numbers<[1], [0], [0], [1], [0, 0, 1, 1], [], []>} : vector<128x8xbf16>, vector<8x32xbf16>, vector<128x32xf32> -> vector<128x32xf32>
    %64 = arith.addf %55, %63 : vector<128x32xf32>
    %c2_i32_46 = arith.constant 2 : i32
    %65 = arith.addi %0, %c2_i32_46 : i32
    %c0_47 = arith.constant 0 : index
    %66 = arith.index_cast %65 : i32 to index
    %c1_48 = arith.constant 1 : index
    %c0_49 = arith.constant 0 : index
    %67 = vector.load %arg2[%c0_47, %66, %c1_48, %c0_49] : memref<1x18x18x8xbf16, #tpu.memory_space<vmem>>, vector<1x8x16x8xbf16>
    %68 = vector.shape_cast %67 : vector<1x8x16x8xbf16> to vector<8x16x8xbf16>
    %69 = vector.shape_cast %68 : vector<8x16x8xbf16> to vector<128x8xbf16>
    %c7 = arith.constant 7 : index
    %c0_50 = arith.constant 0 : index
    %c0_51 = arith.constant 0 : index
    %70 = vector.load %arg3[%c7, %c0_50, %c0_51] : memref<9x8x32xbf16, #tpu.memory_space<vmem>>, vector<1x8x32xbf16>
    %71 = vector.shape_cast %70 : vector<1x8x32xbf16> to vector<8x32xbf16>
    %cst_52 = arith.constant dense<0.000000e+00> : vector<128x32xf32>
    %72 = tpu.matmul %69, %71, %cst_52 {dimension_numbers = #tpu.dot_dimension_numbers<[1], [0], [0], [1], [0, 0, 1, 1], [], []>} : vector<128x8xbf16>, vector<8x32xbf16>, vector<128x32xf32> -> vector<128x32xf32>
    %73 = arith.addf %64, %72 : vector<128x32xf32>
    %c2_i32_53 = arith.constant 2 : i32
    %74 = arith.addi %0, %c2_i32_53 : i32
    %c0_54 = arith.constant 0 : index
    %75 = arith.index_cast %74 : i32 to index
    %c2_55 = arith.constant 2 : index
    %c0_56 = arith.constant 0 : index
    %76 = vector.load %arg2[%c0_54, %75, %c2_55, %c0_56] : memref<1x18x18x8xbf16, #tpu.memory_space<vmem>>, vector<1x8x16x8xbf16>
    %77 = vector.shape_cast %76 : vector<1x8x16x8xbf16> to vector<8x16x8xbf16>
    %78 = vector.shape_cast %77 : vector<8x16x8xbf16> to vector<128x8xbf16>
    %c8 = arith.constant 8 : index
    %c0_57 = arith.constant 0 : index
    %c0_58 = arith.constant 0 : index
    %79 = vector.load %arg3[%c8, %c0_57, %c0_58] : memref<9x8x32xbf16, #tpu.memory_space<vmem>>, vector<1x8x32xbf16>
    %80 = vector.shape_cast %79 : vector<1x8x32xbf16> to vector<8x32xbf16>
    %cst_59 = arith.constant dense<0.000000e+00> : vector<128x32xf32>
    %81 = tpu.matmul %78, %80, %cst_59 {dimension_numbers = #tpu.dot_dimension_numbers<[1], [0], [0], [1], [0, 0, 1, 1], [], []>} : vector<128x8xbf16>, vector<8x32xbf16>, vector<128x32xf32> -> vector<128x32xf32>
    %82 = arith.addf %73, %81 : vector<128x32xf32>
    %c0_60 = arith.constant 0 : index
    %c0_61 = arith.constant 0 : index
    %83 = vector.load %arg4[%c0_60, %c0_61] : memref<1x32xf32, #tpu.memory_space<vmem>>, vector<1x32xf32>
    %84 = vector.broadcast %83 : vector<1x32xf32> to vector<128x32xf32>
    %85 = arith.addf %82, %84 : vector<128x32xf32>
    %cst_62 = arith.constant 0.000000e+00 : f32
    %86 = vector.broadcast %cst_62 : f32 to vector<128x32xf32>
    %87 = arith.cmpf oge, %85, %86 : vector<128x32xf32>
    %cst_63 = arith.constant 1.000000e-01 : f32
    %88 = vector.broadcast %cst_63 : f32 to vector<128x32xf32>
    %89 = arith.mulf %85, %88 : vector<128x32xf32>
    %90 = arith.select %87, %85, %89 : vector<128x32xi1>, vector<128x32xf32>
    %91 = vector.shape_cast %90 : vector<128x32xf32> to vector<1x8x16x32xf32>
    %c0_64 = arith.constant 0 : index
    %c0_65 = arith.constant 0 : index
    %c0_66 = arith.constant 0 : index
    %c0_67 = arith.constant 0 : index
    %92 = vector.load %arg5[%c0_64, %c0_65, %c0_66, %c0_67] : memref<1x8x16x32xf32, #tpu.memory_space<vmem>>, vector<1x8x16x32xf32>
    tpu.vector_store %arg5[%c0_64, %c0_65, %c0_66, %c0_67], %91 {strides = array<i32>} : memref<1x8x16x32xf32, #tpu.memory_space<vmem>>, vector<1x8x16x32xf32>,
    return
  }
  func.func @transform_0(%arg0: i32, %arg1: i32) -> (i32, i32, i32, i32) {
    %c0_i32 = arith.constant 0 : i32
    %c0_i32_0 = arith.constant 0 : i32
    %c0_i32_1 = arith.constant 0 : i32
    %c0_i32_2 = arith.constant 0 : i32
    return %arg0, %c0_i32, %c0_i32_0, %c0_i32_1 : i32, i32, i32, i32
  }
  func.func @transform_1(%arg0: i32, %arg1: i32) -> (i32, i32, i32) {
    %c0_i32 = arith.constant 0 : i32
    %c0_i32_0 = arith.constant 0 : i32
    %c0_i32_1 = arith.constant 0 : i32
    %c0_i32_2 = arith.constant 0 : i32
    return %c0_i32, %c0_i32_0, %c0_i32_1 : i32, i32, i32
  }
  func.func @transform_2(%arg0: i32, %arg1: i32) -> (i32, i32) {
    %c0_i32 = arith.constant 0 : i32
    %c0_i32_0 = arith.constant 0 : i32
    %c0_i32_1 = arith.constant 0 : i32
    return %c0_i32, %c0_i32_0 : i32, i32
  }
  func.func @transform_3(%arg0: i32, %arg1: i32) -> (i32, i32, i32, i32) {
    %c0_i32 = arith.constant 0 : i32
    %c0_i32_0 = arith.constant 0 : i32
    %c0_i32_1 = arith.constant 0 : i32
    return %arg0, %arg1, %c0_i32, %c0_i32_0 : i32, i32, i32, i32
  }
}

</mosaic_0001>

<bundles_post_ra>
// kernel: conv_bn_act.1
= control target key start
LH: loop header
LB: loop body
LE: loop exit
PB: predicated region body
PF: predicated region fallthrough
CT: control target
= control target key end

     0   :  { %8 = vsyncpa [#allocation3], 0  ;;  %s4884_s0 = inlined_call_operand.vmem [shape: bf16[2,18,18,8], index: 0, kind: input, shape index: {}]   ;;  %s4885_s1 = inlined_call_operand.vmem [shape: bf16[9,8,32], index: 1, kind: input, shape index: {}]   ;;  %s4886_s2 = inlined_call_operand.vmem [shape: f32[1,32], index: 2, kind: input, shape index: {}]   ;;  %s4887_s3 = inlined_call_operand.hbm [shape: f32[2,16,16,32], index: 3, kind: output, shape index: {}]  }
   0x1   :  { %10 = vsyncpa [#allocation3 + $0x1], 0  ;;  %s3607_s12 = smov 0   ;;  %s3609_s13 = smov 0  }
   0x2   :  { %s3611_s14 = smov 0   ;;  %s3613_s15 = smov 0  }
   0x3   :  { %s3615_s16 = smov 0   ;;  %s3617_s17 = smov 0  }
   0x4   :  { %s3619_s18 = smov 0   ;;  %s3621_s19 = smov 0  }
   0x5 LB: > { %s2841_s20 = sadd.s32 4294967295, %s3582_s19   ;;  %s2842_s21 = sadd.s32 4294967294, %s3582_s19   ;;  %s3582_s19 = sphi %s3621_s19, %s16_s19   ;;  %s3578_s18 = sphi %s3619_s18, %s4942_s18   ;;  %s3574_s17 = sphi %s3617_s17, %s4941_s17   ;;  %s3570_s16 = sphi %s3615_s16, %s4940_s16   ;;  %s3566_s15 = sphi %s3613_s15, %s4939_s15   ;;  %s3562_s14 = sphi %s3611_s14, %s4938_s14   ;;  %s3558_s13 = sphi %s3609_s13, %s4937_s13   ;;  %s3554_s12 = sphi %s3607_s12, %s4936_s12  }
   0x6   : > { %s25_s22 = sadd.s32 1, %s3574_s17  ;;  %s28_s23 = sadd.s32 1, %s3578_s18 }
   0x7   : > { %p26_p0 = scmp.ge.s32.totalorder %s25_s22, 2  ;;  %p115_p1 = scmp.ne.s32.totalorder %s3562_s14, %s3558_s13 }
   0x8   : > { %p116_p2 = scmp.eq.s32.totalorder %s2841_s20, 3  ;;  %p121_p5 = scmp.ne.s32.totalorder %s3558_s13, %s3554_s12 }
   0x9   : > { %s4944_s22 = smov (%p26_p0, %s25_s22), 0  ;;  %s4946_s23 = smov (!%p26_p0, %s28_s23), %s3578_s18 }
   0xa   : > { %s101_s24 = ssub.s32 %s3574_s17, %s4944_s22  ;;  %p3658_p3 = por %p116_p2, %p115_p1 }
   0xb   : > { %p30_p4 = scmp.ge.s32.totalorder %s4946_s23, 2  ;;  %p122_p6 = scmp.eq.s32.totalorder %s2842_s21, 3 }
   0xc   : > { %p2845_p7 = scmp.ge.s32.totalorder %s3582_s19, 1  ;;  %p154_p9 = scmp.lt.s32.totalorder %s3582_s19, 5 }
   0xd   : > { %s4948_s23 = smov (%p30_p4, %s4946_s23), 0  ;;  %p3667_p8 = por %p122_p6, %p121_p5 }
   0xe   : > { %s100_s27 = ssub.s32 %s3578_s18, %s4948_s23  ;;  %s105_s28 = sadd.s32 1, %s3562_s14 }
   0xf   : > { %s102_s29 = sor.u32 %s101_s24, %s100_s27  ;;  %p155_p10 = pnand %p2845_p7, %p154_p9 }
  0x10   : > { %p103_p11 = scmp.eq.s32.totalorder %s102_s29, 0 }
  0x11   : > { %158 = sbr.rel (%p155_p10) target bundleno = 421 (0x1a5), region = 32 }
  0x12   : > { %s3676_s30 = scalar_select %p103_p11, %s3562_s14, %s105_s28  }
  0x16   : > { %v2851_v0 = vld [vmem:[%s4885_s1 + $0x4] sm:$0xf]  ;;  %vm460_vm0 = vcmask 1043456   ;;  %p178_p12 = scmp.lt.s32.totalorder %s3570_s16, 1  ;;  %v205_v2 = vld [vmem:[%s4885_s1] sm:$0xf] }
  0x17   : > { %3383 = vmatprep.subr.msk.bf16.mxu1 %vm460_vm0, %v2851_v0  ;;  %3382 = vmatprep.subr.msk.bf16.mxu0 %vm460_vm0, %v2851_v0  ;;  %v462_v1 = vsel %vm460_vm0, %v2851_v0, 0  ;;  %v2892_v3 = vld [vmem:[%s4885_s1 + $0x8] sm:$0xf]  ;;  %s3135_s11 = smul.u32 96, %s3566_s15  ;;  %vm214_vm1 = vsmask.f32 3328 }
  0x18   : > { %3381 = vmatpush3.bf16.msra.mxu1 %v462_v1  ;;  %3219 = vmatpush3.bf16.msra.mxu0 %v462_v1  ;;  %s179_s6 = scalar_select %p178_p12, %s3570_s16, 1  ;;  %vm215_vm2 = vsmask.f32 7440  ;;  %vm435_vm3 = vcmask 64512   ;;  %v3724_v15 = vsel %vm460_vm0, %v205_v2, 0  ;;  %v3744_v34 = vsel %vm460_vm0, %v2892_v3, 0 }
  0x19   : > { %3384 = vmatprep.subr.msk.bf16.mxu1 %vm460_vm0, %v205_v2  ;;  %3385 = vmatprep.subr.msk.bf16.mxu0 %vm460_vm0, %v2892_v3  ;;  %vm3739_vm4 = vmor %vm214_vm1, %vm215_vm2  ;;  %vm749_vm5 = vcmask 1042432   ;;  %vm750_vm6 = vcmask 1046532   ;;  %vm2721_vm8 = vcmask 261120   ;;  %s3131_s7 = sshll.u32 %s3570_s16, 5  ;;  %s3584_s24 = smov [#allocation2]  }
  0x1a   : > { %s3392_s20 = smul.u32 216, %s179_s6  ;;  %vm3875_vm7 = vmor %vm749_vm5, %vm750_vm6  ;;  %s3136_s6 = sshll.u32 %s3566_s15, 4 }
  0x1b   : > { %s2752_s15 = sadd.s32 %s3136_s6, %s3131_s7 }
  0x1c   : > { %s182_s27 = scalar_lea.vmem %s4884_s0, %s3392_s20  ;;  %s3132_s16 = sshll.u32 %s2752_s15, 7 }
  0x1d   : > { %s3698_s28 = scalar_lea.vmem %s182_s27, %s3135_s11  ;;  %s175_s27 = sand.u32 1, %s3558_s13  }
  0x1e   : > { %v3701_v4 = vld [vmem:[%s3698_s28] sm:$0xf]  ;;  %v3704_v5 = vld [vmem:[%s3698_s28 + $0x4] sm:$0xf]  ;;  %v3707_v6 = vld [vmem:[%s3698_s28 + $0x8] sm:$0x1]  ;;  %s4823_s11 = scalar_lea.hbm %s4887_s3, %s3132_s16 }
  0x1f   : > { %v218_v7 = vshrl.u32 %v3701_v4, 16  ;;  %v221_v8 = vshll.u32 %v3701_v4, 16  ;;  %v227_v9 = vshll.u32 %v3704_v5, 16  ;;  %v231_v10 = vshrl.u32 %v3704_v5, 16  ;;  %v3714_v11 = vld [vmem:[%s3698_s28 + $0x30] sm:$0xf] }
  0x20   : > { %v237_v12 = vshll.u32 %v3707_v6, 16  ;;  %v3718_v13 = vld [vmem:[%s3698_s28 + $0x34] sm:$0xf]  ;;  %v3721_v14 = vld [vmem:[%s3698_s28 + $0x38] sm:$0x1]  ;;  %v314_v21 = vshrl.u32 %v3714_v11, 16 }
  0x21   : > { %v220_v16 = vrot.slane %v218_v7, 4  ;;  %v223_v17 = vrot.slane %v221_v8, 5  ;;  %v229_v18 = vrot.slane %v227_v9, 5  ;;  %v233_v19 = vrot.slane %v231_v10, 4  ;;  %v3732_v28 = vld [vmem:[%s3698_s28 + $0xc] sm:$0xf] }
  0x22   : > { %v239_v20 = vrot.slane %v237_v12, 5  ;;  %v317_v22 = vshll.u32 %v3714_v11, 16  ;;  %v323_v23 = vshll.u32 %v3718_v13, 16  ;;  %v327_v26 = vshrl.u32 %v3718_v13, 16  ;;  %v3735_v29 = vld [vmem:[%s3698_s28 + $0x10] sm:$0xf] }
  0x23   : > { %v224_v24 = vor.u32 %v223_v17, %v220_v16  ;;  %v234_v25 = vor.u32 %v233_v19, %v229_v18  ;;  %v333_v27 = vshll.u32 %v3721_v14, 16  ;;  %v316_v31 = vrot.slane %v314_v21, 4  ;;  %v3747_v40 = vld [vmem:[%s3698_s28 + $0x14] sm:$0x1]  ;;  %v3758_v52 = vld [vmem:[%s3698_s28 + $0x3c] sm:$0xf] }
  0x24   : > { %v319_v32 = vrot.slane %v317_v22, 5  ;;  %v325_v33 = vrot.slane %v323_v23, 5  ;;  %v329_v37 = vrot.slane %v327_v26, 4  ;;  %v242_v41 = vshrl.u32 %v3732_v28, 16  ;;  %v3762_v57 = vld [vmem:[%s3698_s28 + $0x40] sm:$0xf] }
  0x25   : > { %v225_v35 = vrot.slane %v224_v24, 4  ;;  %v235_v36 = vrot.slane %v234_v25, 4  ;;  %v335_v38 = vrot.slane %v333_v27, 5  ;;  %v245_v42 = vshll.u32 %v3732_v28, 16  ;;  %v3770_v62 = vld [vmem:[%s3698_s28 + $0x44] sm:$0x1] }
  0x26   : > { %v320_v39 = vor.u32 %v319_v32, %v316_v31  ;;  %v251_v43 = vshll.u32 %v3735_v29, 16  ;;  %v330_v46 = vor.u32 %v329_v37, %v325_v33  ;;  %v255_v47 = vshrl.u32 %v3735_v29, 16  ;;  %v3776_v3 = vld [vmem:[%s3698_s28 + $0x18] sm:$0xf]  ;;  %v3783_v19 = vld [vmem:[%s3698_s28 + $0x1c] sm:$0xf] }
  0x27   : > { %v230_v44 = vsel %vm3739_vm4, %v225_v35, %v229_v18  ;;  %v240_v45 = vsel %vm3739_vm4, %v235_v36, %v239_v20  ;;  %v244_v50 = vrot.slane %v242_v41, 4  ;;  %v247_v51 = vrot.slane %v245_v42, 5  ;;  %v3789_v23 = vld [vmem:[%s3698_s28 + $0x20] sm:$0x1]  ;;  %v3796_v32 = vld [vmem:[%s3698_s28 + $0x48] sm:$0xf] }
  0x28   : > { %v2852_v48 = vcombine.low %v230_v44, %v240_v45  ;;  %v321_v49 = vrot.slane %v320_v39, 4  ;;  %v331_v53 = vrot.slane %v330_v46, 4  ;;  %v253_v54 = vrot.slane %v251_v43, 5  ;;  %v3807_v44 = vld [vmem:[%s3698_s28 + $0x4c] sm:$0xf]  ;;  %s2846_s4 = sshll.u32 %s175_s27, 7 }
  0x29   : > { %v257_v55 = vrot.slane %v255_v47, 4  ;;  %v261_v56 = vshll.u32 %v3747_v40, 16  ;;  %v757_v58 = vrot.slane %v3707_v6, 5  ;;  %v248_v60 = vor.u32 %v247_v51, %v244_v50  ;;  %s4752_s5 = scalar_lea.vmem [#allocation2], %s2846_s4  ;;  %s4833_s20 = scalar_lea.sflag [#allocation3], %s175_s27 }
  0x2a   : > { %3220 = vmatprep.mubr.msk.bf16.mxu0 %vm435_vm3, %v2852_v48  ;;  %v326_v59 = vsel %vm3739_vm4, %v321_v49, %v325_v33  ;;  %v761_v61 = vrot.slane %v3735_v29, 5  ;;  %v336_v63 = vsel %vm3739_vm4, %v331_v53, %v335_v38  ;;  %v338_v2 = vshrl.u32 %v3758_v52, 16  ;;  %v3802_v38 = vld [vmem:[%s4885_s1 + $0x10] sm:$0xf]  ;;  %s2755_s8 = sshll.u32 %s4752_s5, 4  ;;  %s4825_s8 = int_to_ptr.vmem [resolvable:$true] %s2755_s8 }
  0x2b   : > { %v258_v0 = vor.u32 %v257_v55, %v253_v54  ;;  %v263_v1 = vrot.slane %v261_v56, 5  ;;  %v2856_v7 = vcombine.low %v326_v59, %v336_v63  ;;  %v249_v8 = vrot.slane %v248_v60, 4  ;;  %v3820_v63 = vld [vmem:[%s3698_s28 + $0x24] sm:$0xf]  ;;  %s3490_s21 = scalar_lea.vmem %s4825_s8, 2048 }
  0x2c   : > { %v341_v9 = vshll.u32 %v3758_v52, 16  ;;  %v347_v10 = vshll.u32 %v3762_v57, 16  ;;  %v340_v16 = vrot.slane %v338_v2, 4  ;;  %v351_v17 = vshrl.u32 %v3762_v57, 16  ;;  %p3491_p13 = scmp.ne.s32.totalorder %s4825_s8, %s3490_s21 }
  0x2d   : > { %v259_v12 = vrot.slane %v258_v0, 4  ;;  %v357_v18 = vshll.u32 %v3770_v62, 16  ;;  %3228 = vmatprep.mubr.msk.bf16.mxu1 %vm435_vm3, %v2856_v7  ;;  %v254_v20 = vsel %vm3739_vm4, %v249_v8, %v253_v54  ;;  %v266_v24 = vshrl.u32 %v3776_v3, 16  ;;  %v3814_v54 = vld [vmem:[%s3698_s28 + $0x50] sm:$0x1] }
  0x2e   : > { %v343_v21 = vrot.slane %v341_v9, 5  ;;  %v349_v22 = vrot.slane %v347_v10, 5  ;;  %v353_v26 = vrot.slane %v351_v17, 4  ;;  %v269_v31 = vshll.u32 %v3776_v3, 16  ;;  %v3828_v7 = vld [vmem:[%s3698_s28 + $0x28] sm:$0xf]  ;;  %p3492_p0 = pnand %p3491_p13, %p3658_p3 }
  0x2f   : > { %v264_v25 = vsel %vm3739_vm4, %v259_v12, %v263_v1  ;;  %v359_v27 = vrot.slane %v357_v18, 5  ;;  %v268_v36 = vrot.slane %v266_v24, 4  ;;  %v275_v37 = vshll.u32 %v3783_v19, 16  ;;  %v3833_v8 = vld [vmem:[%s4885_s1 + $0xc] sm:$0xf] }
  0x30   : > { %v2853_v33 = vcombine.low %v254_v20, %v264_v25  ;;  %v344_v35 = vor.u32 %v343_v21, %v340_v16  ;;  %v354_v39 = vor.u32 %v353_v26, %v349_v22  ;;  %v271_v41 = vrot.slane %v269_v31, 5  ;;  %v3837_v17 = vld [vmem:[%s3698_s28 + $0x2c] sm:$0x1]  ;;  %v3843_v24 = vld [vmem:[%s3698_s28 + $0x54] sm:$0xf]  ;;  %p3493_p1 = pneg %p3492_p0 }
  0x31   : > { %v279_v42 = vshrl.u32 %v3783_v19, 16  ;;  %v285_v43 = vshll.u32 %v3789_v23, 16  ;;  %v277_v46 = vrot.slane %v275_v37, 5  ;;  %v362_v47 = vshrl.u32 %v3796_v32, 16 }
  0x32   : > { %3221 = vmatmul.mubr.msk.bf16.vlgmr.msra.gmra.mxu0 %vm435_vm3, %v2853_v33  ;;  %v345_v45 = vrot.slane %v344_v35, 4  ;;  %v365_v48 = vshll.u32 %v3796_v32, 16  ;;  %v355_v49 = vrot.slane %v354_v39, 4  ;;  %v272_v50 = vor.u32 %v271_v41, %v268_v36  ;;  %v3849_v33 = vld [vmem:[%s3698_s28 + $0x58] sm:$0xf] }
  0x33   : > { %3255 = vmatpush3.bf16.msra.mxu0 %v3744_v34  ;;  %v281_v51 = vrot.slane %v279_v42, 4  ;;  %v287_v53 = vrot.slane %v285_v43, 5  ;;  %v364_v56 = vrot.slane %v362_v47, 4  ;;  %v371_v60 = vshll.u32 %v3807_v44, 16 }
  0x34   : > { %v350_v55 = vsel %vm3739_vm4, %v345_v45, %v349_v22  ;;  %v367_v59 = vrot.slane %v365_v48, 5  ;;  %3387 = vmatprep.subr.msk.bf16.mxu0 %vm460_vm0, %v3802_v38  ;;  %v360_v34 = vsel %vm3739_vm4, %v355_v49, %v359_v27  ;;  %v273_v0 = vrot.slane %v272_v50, 4  ;;  %v725_v50 = vld [vmem:[%s3698_s28] sm:$0xe] }
  0x35   : > { %v282_v1 = vor.u32 %v281_v51, %v277_v46  ;;  %v375_v2 = vshrl.u32 %v3807_v44, 16  ;;  %v2857_v9 = vcombine.low %v350_v55, %v360_v34  ;;  %v373_v12 = vrot.slane %v371_v60, 5 }
  0x36   : > { %v368_v10 = vor.u32 %v367_v59, %v364_v56  ;;  %v381_v16 = vshll.u32 %v3814_v54, 16  ;;  %v278_v18 = vsel %vm3739_vm4, %v273_v0, %v277_v46  ;;  %v290_v22 = vshrl.u32 %v3820_v63, 16  ;;  %v3858_v46 = vld [vmem:[%s3698_s28 + $0x5c] sm:$0x1] }
  0x37   : > { %v283_v20 = vrot.slane %v282_v1, 4  ;;  %v377_v21 = vrot.slane %v375_v2, 4  ;;  %3229 = vmatmul.mubr.msk.bf16.vlgmr.msra.gmra.mxu1 %vm435_vm3, %v2857_v9  ;;  %v293_v27 = vshll.u32 %v3820_v63, 16  ;;  %v299_v31 = vshll.u32 %v3828_v7, 16 }
  0x38   : > { %v369_v25 = vrot.slane %v368_v10, 4  ;;  %v383_v26 = vrot.slane %v381_v16, 5  ;;  %3237 = vmatpush3.bf16.msra.mxu1 %v3724_v15  ;;  %v292_v37 = vrot.slane %v290_v22, 4  ;;  %v303_v39 = vshrl.u32 %v3828_v7, 16 }
  0x39   : > { %v288_v35 = vsel %vm3739_vm4, %v283_v20, %v287_v53  ;;  %v378_v36 = vor.u32 %v377_v21, %v373_v12  ;;  %v295_v43 = vrot.slane %v293_v27, 5  ;;  %v301_v45 = vrot.slane %v299_v31, 5  ;;  %3386 = vmatprep.subr.msk.bf16.mxu1 %vm460_vm0, %v3833_v8 }
  0x3a   : > { %v2854_v41 = vcombine.low %v278_v18, %v288_v35  ;;  %v374_v42 = vsel %vm3739_vm4, %v369_v25, %v373_v12  ;;  %v305_v15 = vrot.slane %v303_v39, 4  ;;  %v309_v48 = vshll.u32 %v3837_v17, 16  ;;  %v726_v12 = vld [vmem:[%s3698_s28 + $0xc] sm:$0xe] }
  0x3b   : > { %v379_v47 = vrot.slane %v378_v36, 4  ;;  %v386_v49 = vshrl.u32 %v3843_v24, 16  ;;  %v296_v51 = vor.u32 %v295_v43, %v292_v37  ;;  %v389_v53 = vshll.u32 %v3843_v24, 16 }
  0x3c   : > { %3224 = vmatprep.mubr.msk.bf16.mxu0 %vm435_vm3, %v2854_v41  ;;  %v395_v55 = vshll.u32 %v3849_v33, 16  ;;  %v399_v56 = vshrl.u32 %v3849_v33, 16  ;;  %v306_v60 = vor.u32 %v305_v15, %v301_v45  ;;  %v311_v34 = vrot.slane %v309_v48, 5  ;;  %v727_v41 = vld [vmem:[%s3698_s28 + $0x18] sm:$0xe] }
  0x3d   : > { %v384_v59 = vsel %vm3739_vm4, %v379_v47, %v383_v26  ;;  %v388_v0 = vrot.slane %v386_v49, 4  ;;  %v297_v2 = vrot.slane %v296_v51, 4  ;;  %v391_v9 = vrot.slane %v389_v53, 5 }
  0x3e   : > { %v2858_v1 = vcombine.low %v374_v42, %v384_v59  ;;  %v397_v10 = vrot.slane %v395_v55, 5  ;;  %v307_v16 = vrot.slane %v306_v60, 4  ;;  %v401_v18 = vrot.slane %v399_v56, 4  ;;  %v729_v55 = vld [vmem:[%s3698_s28 + $0x30] sm:$0xe] }
  0x3f   : > { %v405_v20 = vshll.u32 %v3858_v46, 16  ;;  %v2884_v22 = vrot.slane %v725_v50, 9  ;;  %v764_v25 = vrot.slane %v3747_v40, 5  ;;  %v302_v26 = vsel %vm3739_vm4, %v297_v2, %v301_v45 }
  0x40   : > { %3232 = vmatprep.mubr.msk.bf16.mxu1 %vm435_vm3, %v2858_v1  ;;  %v392_v27 = vor.u32 %v391_v9, %v388_v0  ;;  %v754_v31 = vrot.slane %v3704_v5, 5  ;;  %v312_v35 = vsel %vm3739_vm4, %v307_v16, %v311_v34  ;;  %v402_v36 = vor.u32 %v401_v18, %v397_v10  ;;  %v3036_v1 = vld [vmem:[%s4885_s1 + $0x18] sm:$0xf] }
  0x41   : > { %v407_v37 = vrot.slane %v405_v20, 5  ;;  %v2885_v39 = vrot.slane %v726_v12, 9  ;;  %v2855_v42 = vcombine.low %v302_v26, %v312_v35  ;;  %v2868_v45 = vcombine.low %v3701_v4, %v3704_v5  ;;  %v728_v5 = vld [vmem:[%s3698_s28 + $0x24] sm:$0xe]  ;;  %v730_v12 = vld [vmem:[%s3698_s28 + $0x3c] sm:$0xe] }
  0x42   : > { %v393_v43 = vrot.slane %v392_v27, 4  ;;  %v755_v40 = vsel %vm3875_vm7, %v2884_v22, %v754_v31  ;;  %v756_v47 = vrot.slane %v754_v31, 4  ;;  %v403_v15 = vrot.slane %v402_v36, 4 }
  0x43   : > { %v762_v48 = vsel %vm3875_vm7, %v2885_v39, %v761_v61  ;;  %v763_v49 = vrot.slane %v761_v61, 4  ;;  %3225 = vmatmul.mubr.msk.bf16.gmra.mxu0 %vm435_vm3, %v2855_v42  ;;  %v2886_v53 = vrot.slane %v727_v41, 9  ;;  %v768_v4 = vrot.slane %v3783_v19, 5  ;;  %v731_v41 = vld [vmem:[%s3698_s28 + $0x48] sm:$0xe] }
  0x44   : > { %v398_v50 = vsel %vm3739_vm4, %v393_v43, %v397_v10  ;;  %v758_v51 = vsel %vm3875_vm7, %v756_v47, %v757_v58  ;;  %v408_v56 = vsel %vm3739_vm4, %v403_v15, %v407_v37  ;;  %v771_v60 = vrot.slane %v3789_v23, 5  ;;  %v3953_v42 = vld [vmem:[%s3698_s28 + $0x54] sm:$0xe]  ;;  %v2944_v43 = vld [vmem:[%s3698_s28 + $0xc] sm:$0xf] }
  0x45   : > { %v2893_v61 = vcombine.low %v755_v40, %v758_v51  ;;  %v765_v59 = vsel %vm3875_vm7, %v763_v49, %v764_v25  ;;  %v2859_v34 = vcombine.low %v398_v50, %v408_v56  ;;  %v1061_v6 = vsel %vm460_vm0, %v3833_v8, 0  ;;  %v3973_v49 = vld [vmem:[%s4885_s1 + $0x14] sm:$0xf] }
  0x46   : > { %v769_v58 = vsel %vm3875_vm7, %v2886_v53, %v768_v4  ;;  %v770_v0 = vrot.slane %v768_v4, 4  ;;  %v785_v2 = vrot.slane %v3721_v14, 5  ;;  %v2887_v9 = vrot.slane %v728_v5, 9  ;;  %v2947_v5 = vld [vmem:[%s3698_s28 + $0x18] sm:$0xf] }
  0x47   : > { %3256 = vmatprep.mubr.msk.bf16.mxu0 %vm435_vm3, %v2893_v61  ;;  %v775_v10 = vrot.slane %v3828_v7, 5  ;;  %v778_v23 = vrot.slane %v3837_v17, 5  ;;  %3233 = vmatmul.mubr.msk.bf16.gmra.mxu1 %vm435_vm3, %v2859_v34  ;;  %v2894_v8 = vcombine.low %v762_v48, %v765_v59  ;;  %v2888_v18 = vrot.slane %v729_v55, 9  ;;  %v3968_v48 = vld [vmem:[%s3698_s28 + $0x14] sm:$0x1] }
  0x48   : > { %v772_v16 = vsel %vm3875_vm7, %v770_v0, %v771_v60  ;;  %v782_v20 = vrot.slane %v3718_v13, 5  ;;  %3238 = vmatprep.mubr.msk.bf16.mxu1 %vm435_vm3, %v2868_v45  ;;  %v1443_v14 = vsel %vm460_vm0, %v3802_v38, 0  ;;  %v3932_v17 = vsel %vm460_vm0, %v3036_v1, 0  ;;  %v3984_v60 = vld [vmem:[%s3698_s28 + $0x1c] sm:$0xf] }
  0x49   : > { %v2895_v22 = vcombine.low %v769_v58, %v772_v16  ;;  %v777_v25 = vrot.slane %v775_v10, 4  ;;  %v2869_v26 = vcombine.low %v3732_v28, %v3735_v29  ;;  %v2889_v31 = vrot.slane %v730_v12, 9 }
  0x4a   : > { %v784_v27 = vrot.slane %v782_v20, 4  ;;  %v789_v35 = vrot.slane %v3762_v57, 5  ;;  %v2870_v36 = vcombine.low %v3776_v3, %v3783_v19  ;;  %v776_v38 = vsel %vm3875_vm7, %v2887_v9, %v775_v10 }
  0x4b   : > { %v779_v37 = vsel %vm3875_vm7, %v777_v25, %v778_v23  ;;  %v783_v39 = vsel %vm3875_vm7, %v2888_v18, %v782_v20  ;;  %3257 = vmatmul.mubr.msk.bf16.vlgmr.msra.gmra.mxu0 %vm435_vm3, %v2894_v8  ;;  %v2871_v28 = vcombine.low %v3820_v63, %v3828_v7  ;;  %v792_v19 = vrot.slane %v3770_v62, 5  ;;  %v3965_v62 = vld [vmem:[%s3698_s28 + $0x10] sm:$0xf] }
  0x4c   : > { %v786_v29 = vsel %vm3875_vm7, %v784_v27, %v785_v2  ;;  %v791_v3 = vrot.slane %v789_v35, 4  ;;  %3291 = vmatpush3.bf16.msra.mxu0 %v1443_v14  ;;  %3260 = vmatprep.mubr.msk.bf16.mxu0 %vm435_vm3, %v2895_v22  ;;  %v2872_v40 = vcombine.low %v3714_v11, %v3718_v13  ;;  %v2873_v47 = vcombine.low %v3758_v52, %v3762_v57  ;;  %v2950_v2 = vld [vmem:[%s3698_s28 + $0x24] sm:$0xf]  ;;  %v4007_v22 = vld [vmem:[%s3698_s28 + $0x20] sm:$0x1] }
  0x4d   : > { %v2874_v15 = vcombine.low %v3796_v32, %v3807_v44  ;;  %v796_v45 = vrot.slane %v3807_v44, 5  ;;  %v2896_v50 = vcombine.low %v776_v38, %v779_v37  ;;  %v2897_v51 = vcombine.low %v783_v39, %v786_v29  ;;  %3389 = vmatprep.subr.msk.bf16.mxu0 %vm460_vm0, %v3036_v1  ;;  %v2956_v13 = vld [vmem:[%s3698_s28 + $0x3c] sm:$0xf]  ;;  %v4080_v57 = vld [vmem:[%s3698_s28 + $0x4c] sm:$0xf] }
  0x4e   : > { %v3977_v53 = vsel %vm3875_vm7, %v2889_v31, %v789_v35  ;;  %v2890_v4 = vrot.slane %v731_v41, 9  ;;  %v799_v56 = vrot.slane %v3814_v54, 5  ;;  %v803_v61 = vrot.slane %v3849_v33, 5  ;;  %v4013_v35 = vld [vmem:[%s3698_s28 + $0x28] sm:$0xf] }
  0x4f   : > { %v798_v55 = vrot.slane %v796_v45, 4  ;;  %v1201_v59 = vshrl.u32 %v2944_v43, 16  ;;  %3239 = vmatmul.mubr.msk.bf16.vlgmr.msra.gmra.mxu1 %vm435_vm3, %v2869_v26  ;;  %v3989_v34 = vsel %vm3875_vm7, %v791_v3, %v792_v19  ;;  %v2875_v58 = vcombine.low %v3843_v24, %v3849_v33 }
  0x50   : > { %v1204_v0 = vshll.u32 %v2944_v43, 16  ;;  %v1210_v1 = vshll.u32 %v3965_v62, 16  ;;  %3273 = vmatpush3.bf16.msra.mxu1 %v1061_v6  ;;  %3242 = vmatprep.mubr.msk.bf16.mxu1 %vm435_vm3, %v2870_v36  ;;  %v2891_v54 = vrot.slane %v3953_v42, 9  ;;  %v1214_v10 = vshrl.u32 %v3965_v62, 16  ;;  %v4019_v42 = vld [vmem:[%s3698_s28 + $0x2c] sm:$0x1] }
  0x51   : > { %v1203_v9 = vrot.slane %v1201_v59, 4  ;;  %v1220_v23 = vshll.u32 %v3968_v48, 16  ;;  %v797_v12 = vsel %vm3875_vm7, %v2890_v4, %v796_v45  ;;  %v806_v8 = vrot.slane %v3858_v46, 5  ;;  %3388 = vmatprep.subr.msk.bf16.mxu1 %vm460_vm0, %v3973_v49 }
  0x52   : > { %v1206_v16 = vrot.slane %v1204_v0, 5  ;;  %v1212_v18 = vrot.slane %v1210_v1, 5  ;;  %v800_v6 = vsel %vm3875_vm7, %v798_v55, %v799_v56  ;;  %v805_v20 = vrot.slane %v803_v61, 4 }
  0x53   : > { %v1216_v14 = vrot.slane %v1214_v10, 4  ;;  %v1225_v25 = vshrl.u32 %v2947_v5, 16  ;;  %3261 = vmatmul.mubr.msk.bf16.gmra.mxu0 %vm435_vm3, %v2896_v50  ;;  %v1228_v27 = vshll.u32 %v2947_v5, 16  ;;  %v1234_v46 = vshll.u32 %v3984_v60, 16  ;;  %v2953_v5 = vld [vmem:[%s3698_s28 + $0x30] sm:$0xf] }
  0x54   : > { %v1207_v26 = vor.u32 %v1206_v16, %v1203_v9  ;;  %v1238_v31 = vshrl.u32 %v3984_v60, 16  ;;  %3264 = vmatprep.mubr.msk.bf16.mxu0 %vm435_vm3, %v2897_v51  ;;  %v1222_v38 = vrot.slane %v1220_v23, 5  ;;  %v1249_v39 = vshrl.u32 %v2950_v2, 16  ;;  %v4052_v9 = vld [vmem:[%s3698_s28 + $0x38] sm:$0x1] }
  0x55   : > { %v1217_v36 = vor.u32 %v1216_v14, %v1212_v18  ;;  %v1227_v37 = vrot.slane %v1225_v25, 4  ;;  %v1230_v29 = vrot.slane %v1228_v27, 5  ;;  %v4016_v3 = vrot.slane %v1234_v46, 5  ;;  %v4059_v25 = vld [vmem:[%s3698_s28 + $0x40] sm:$0xf] }
  0x56   : > { %v1208_v41 = vrot.slane %v1207_v26, 4  ;;  %v1240_v19 = vrot.slane %v1238_v31, 4  ;;  %v2898_v43 = vcombine.low %v3977_v53, %v3989_v34  ;;  %v1251_v50 = vrot.slane %v1249_v39, 4  ;;  %v4040_v34 = vld [vmem:[%s3698_s28 + $0x34] sm:$0xf] }
  0x57   : > { %v1218_v45 = vrot.slane %v1217_v36, 4  ;;  %v1252_v4 = vshll.u32 %v2950_v2, 16  ;;  %3243 = vmatmul.mubr.msk.bf16.gmra.mxu1 %vm435_vm3, %v2871_v28  ;;  %v2899_v51 = vcombine.low %v797_v12, %v800_v6  ;;  %v804_v55 = vsel %vm3875_vm7, %v2891_v54, %v803_v61  ;;  %v4065_v36 = vld [vmem:[%s3698_s28 + $0x44] sm:$0x1] }
  0x58   : > { %v1244_v56 = vshll.u32 %v4007_v22, 16  ;;  %v1258_v59 = vshll.u32 %v4013_v35, 16  ;;  %3246 = vmatprep.mubr.msk.bf16.mxu1 %vm435_vm3, %v2872_v40  ;;  %v807_v63 = vsel %vm3875_vm7, %v805_v20, %v806_v8  ;;  %v1231_v7 = vor.u32 %v1230_v29, %v1227_v37 }
  0x59   : > { %v1254_v53 = vrot.slane %v1252_v4, 5  ;;  %v1262_v28 = vshrl.u32 %v4013_v35, 16  ;;  %v1213_v61 = vsel %vm3739_vm4, %v1208_v41, %v1212_v18  ;;  %v1223_v0 = vsel %vm3739_vm4, %v1218_v45, %v1222_v38 }
  0x5a   : > { %v1241_v1 = vor.u32 %v1240_v19, %v4016_v3  ;;  %v4047_v11 = vrot.slane %v1258_v59, 5  ;;  %v1268_v54 = vshll.u32 %v4019_v42, 16  ;;  %v1273_v10 = vshrl.u32 %v2953_v5, 16 }
  0x5b   : > { %v1255_v40 = vor.u32 %v1254_v53, %v1251_v50  ;;  %v1264_v2 = vrot.slane %v1262_v28, 4  ;;  %3265 = vmatmul.mubr.msk.bf16.gmra.mxu0 %vm435_vm3, %v2898_v43  ;;  %v2900_v23 = vcombine.low %v804_v55, %v807_v63  ;;  %v1246_v12 = vrot.slane %v1244_v56, 5  ;;  %v2959_v50 = vld [vmem:[%s3698_s28 + $0x48] sm:$0xf] }
  0x5c   : > { %v1276_v8 = vshll.u32 %v2953_v5, 16  ;;  %v1282_v16 = vshll.u32 %v4040_v34, 16  ;;  %3268 = vmatprep.mubr.msk.bf16.mxu0 %vm435_vm3, %v2899_v51  ;;  %v2969_v18 = vcombine.low %v1213_v61, %v1223_v0  ;;  %v1232_v6 = vrot.slane %v1231_v7, 4  ;;  %v3474_v61 = vld [vmem:[%s3698_s28 + $0xc] sm:$0xff]  }
  0x5d   : > { %v1265_v20 = vor.u32 %v1264_v2, %v4047_v11  ;;  %v1275_v14 = vrot.slane %v1273_v10, 4  ;;  %v1242_v26 = vrot.slane %v1241_v1, 4  ;;  %v1286_v31 = vshrl.u32 %v4040_v34, 16  ;;  %v2962_v2 = vld [vmem:[%s3698_s28 + $0x54] sm:$0xf] }
  0x5e   : > { %v1278_v27 = vrot.slane %v1276_v8, 5  ;;  %v4061_v46 = vrot.slane %v1282_v16, 5  ;;  %v1256_v38 = vrot.slane %v1255_v40, 4  ;;  %v1270_v37 = vrot.slane %v1268_v54, 5 }
  0x5f   : > { %v1297_v39 = vshrl.u32 %v2956_v13, 16  ;;  %v1300_v41 = vshll.u32 %v2956_v13, 16  ;;  %3247 = vmatmul.mubr.msk.bf16.gmra.mxu1 %vm435_vm3, %v2873_v47  ;;  %v1266_v29 = vrot.slane %v1265_v20, 4  ;;  %v1288_v19 = vrot.slane %v1286_v31, 4 }
  0x60   : > { %v1292_v43 = vshll.u32 %v4052_v9, 16  ;;  %v1306_v45 = vshll.u32 %v4059_v25, 16  ;;  %3250 = vmatprep.mubr.msk.bf16.mxu1 %vm435_vm3, %v2874_v15  ;;  %v1279_v4 = vor.u32 %v1278_v27, %v1275_v14  ;;  %v1310_v52 = vshrl.u32 %v4059_v25, 16 }
  0x61   : > { %v1299_v5 = vrot.slane %v1297_v39, 4  ;;  %v1302_v51 = vrot.slane %v1300_v41, 5  ;;  %v1237_v47 = vsel %vm3739_vm4, %v1232_v6, %v4016_v3  ;;  %v1247_v55 = vsel %vm3739_vm4, %v1242_v26, %v1246_v12  ;;  %v4104_v12 = vld [vmem:[%s3698_s28 + $0x58] sm:$0xf]  ;;  %v4122_v39 = vld [vmem:[%s3698_s28 + $0x5c] sm:$0x1] }
  0x62   : > { %v1289_v56 = vor.u32 %v1288_v19, %v4061_v46  ;;  %v4088_v32 = vrot.slane %v1306_v45, 5  ;;  %v1312_v15 = vrot.slane %v1310_v52, 4  ;;  %v1316_v59 = vshll.u32 %v4065_v36, 16  ;;  %v3475_v52 = vld [vmem:[%s3698_s28 + $0x18] sm:$0xff]  }
  0x63   : > { %v1303_v44 = vor.u32 %v1302_v51, %v1299_v5  ;;  %v1321_v63 = vshrl.u32 %v2959_v50, 16  ;;  %3269 = vmatmul.mubr.msk.bf16.gmra.mxu0 %vm435_vm3, %v2900_v23  ;;  %v1261_v3 = vsel %vm3739_vm4, %v1256_v38, %v4047_v11  ;;  %v1271_v7 = vsel %vm3739_vm4, %v1266_v29, %v1270_v37  ;;  %v4139_v51 = vld [vmem:[%s4885_s1 + $0x20] sm:$0xf] }
  0x64   : > { %v1324_v53 = vshll.u32 %v2959_v50, 16  ;;  %v1330_v28 = vshll.u32 %v4080_v57, 16  ;;  %3292 = vmatprep.mubr.msk.bf16.mxu0 %vm435_vm3, %v2969_v18  ;;  %v1280_v0 = vrot.slane %v1279_v4, 4  ;;  %v1290_v1 = vrot.slane %v1289_v56, 4  ;;  %v4107_v18 = vld [vmem:[%s3698_s28 + $0x50] sm:$0x1] }
  0x65   : > { %v1294_v13 = vrot.slane %v1292_v43, 5  ;;  %v1313_v40 = vor.u32 %v1312_v15, %v4088_v32  ;;  %v1304_v54 = vrot.slane %v1303_v44, 4  ;;  %v1323_v10 = vrot.slane %v1321_v63, 4  ;;  %v4132_v43 = vld [vmem:[%s3698_s28 + $0x64] sm:$0xf] }
  0x66   : > { %v1326_v23 = vrot.slane %v1324_v53, 5  ;;  %v1334_v11 = vshrl.u32 %v4080_v57, 16  ;;  %v2970_v8 = vcombine.low %v1237_v47, %v1247_v55  ;;  %v2971_v16 = vcombine.low %v1261_v3, %v1271_v7  ;;  %v3476_v44 = vld [vmem:[%s3698_s28 + $0x24] sm:$0xff]  }
  0x67   : > { %v1314_v6 = vrot.slane %v1313_v40, 4  ;;  %v1318_v20 = vrot.slane %v1316_v59, 5  ;;  %3251 = vmatmul.mubr.msk.bf16.gmra.mxu1 %vm435_vm3, %v2875_v58  ;;  %v4113_v14 = vrot.slane %v1330_v28, 5  ;;  %v1345_v27 = vshrl.u32 %v2962_v2, 16  ;;  %v2965_v58 = vld [vmem:[%s3698_s28 + $0x60] sm:$0xf] }
  0x68   : > { %v1336_v26 = vrot.slane %v1334_v11, 4  ;;  %v1348_v31 = vshll.u32 %v2962_v2, 16  ;;  %3274 = vmatprep.mubr.msk.bf16.mxu1 %vm435_vm3, %v3474_v61  ;;  %v1285_v38 = vsel %vm3739_vm4, %v1280_v0, %v4061_v46  ;;  %v1295_v37 = vsel %vm3739_vm4, %v1290_v1, %v1294_v13  ;;  %v3077_v0 = vld [vmem:[%s4885_s1 + $0x1c] sm:$0xf]  ;;  %v4160_v11 = vld [vmem:[%s3698_s28 + $0x68] sm:$0x1] }
  0x69   : > { %v1354_v24 = vshll.u32 %v4104_v12, 16  ;;  %v1358_v33 = vshrl.u32 %v4104_v12, 16  ;;  %v1309_v41 = vsel %vm3739_vm4, %v1304_v54, %v4088_v32  ;;  %v1327_v29 = vor.u32 %v1326_v23, %v1323_v10 }
  0x6a   : > { %v1340_v19 = vshll.u32 %v4107_v18, 16  ;;  %v1347_v46 = vrot.slane %v1345_v27, 4  ;;  %v1319_v45 = vsel %vm3739_vm4, %v1314_v6, %v1318_v20  ;;  %v1350_v50 = vrot.slane %v1348_v31, 5 }
  0x6b   : > { %v1356_v4 = vrot.slane %v1354_v24, 5  ;;  %v1360_v5 = vrot.slane %v1358_v33, 4  ;;  %3293 = vmatmul.mubr.msk.bf16.vlgmr.msra.gmra.mxu0 %vm435_vm3, %v2970_v8  ;;  %v1337_v47 = vor.u32 %v1336_v26, %v4113_v14  ;;  %v1364_v55 = vshll.u32 %v4122_v39, 16  ;;  %v3477_v8 = vld [vmem:[%s3698_s28 + $0x30] sm:$0xff]   ;;  %v3478_v26 = vld [vmem:[%s3698_s28 + $0x3c] sm:$0xff]  }
  0x6c   : > { %v1369_v56 = vshrl.u32 %v2965_v58, 16  ;;  %v1372_v32 = vshll.u32 %v2965_v58, 16  ;;  %3327 = vmatpush3.bf16.msra.mxu0 %v3932_v17  ;;  %3296 = vmatprep.mubr.msk.bf16.mxu0 %vm435_vm3, %v2971_v16  ;;  %v1351_v15 = vor.u32 %v1350_v50, %v1347_v46  ;;  %v1378_v63 = vshll.u32 %v4132_v43, 16  ;;  %v2985_v33 = vld [vmem:[%s3698_s28 + $0xc] sm:$0xe] }
  0x6d   : > { %v1361_v59 = vor.u32 %v1360_v5, %v1356_v4  ;;  %v1697_v3 = vsel %vm460_vm0, %v3973_v49, 0  ;;  %v1382_v7 = vshrl.u32 %v4132_v43, 16  ;;  %3391 = vmatprep.subr.msk.bf16.mxu0 %vm460_vm0, %v4139_v51  ;;  %v2972_v53 = vcombine.low %v1285_v38, %v1295_v37  ;;  %v2986_v46 = vld [vmem:[%s3698_s28 + $0x18] sm:$0xe]  ;;  %v3479_v5 = vld [vmem:[%s3698_s28 + $0x48] sm:$0xff]  }
  0x6e   : > { %v2973_v28 = vcombine.low %v1309_v41, %v1319_v45  ;;  %v1328_v61 = vrot.slane %v1327_v29, 4  ;;  %v1342_v17 = vrot.slane %v1340_v19, 5  ;;  %v1338_v1 = vrot.slane %v1337_v47, 4 }
  0x6f   : > { %3275 = vmatmul.mubr.msk.bf16.vlgmr.msra.gmra.mxu1 %vm435_vm3, %v3475_v52  ;;  %v1366_v13 = vrot.slane %v1364_v55, 5  ;;  %v1371_v49 = vrot.slane %v1369_v56, 4  ;;  %v1374_v40 = vrot.slane %v1372_v32, 5  ;;  %v1352_v2 = vrot.slane %v1351_v15, 4  ;;  %v3480_v56 = vld [vmem:[%s3698_s28 + $0x54] sm:$0xff]  }
  0x70   : > { %3309 = vmatpush3.bf16.msra.mxu1 %v1697_v3  ;;  %3278 = vmatprep.mubr.msk.bf16.mxu1 %vm435_vm3, %v3476_v44  ;;  %v1362_v54 = vrot.slane %v1361_v59, 4  ;;  %v1380_v10 = vrot.slane %v1378_v63, 5  ;;  %v1384_v23 = vrot.slane %v1382_v7, 4  ;;  %v1333_v16 = vsel %vm3739_vm4, %v1328_v61, %v4113_v14  ;;  %v2988_v63 = vld [vmem:[%s3698_s28 + $0x30] sm:$0xe] }
  0x71   : > { %3390 = vmatprep.subr.msk.bf16.mxu1 %vm460_vm0, %v3077_v0  ;;  %v1343_v6 = vsel %vm3739_vm4, %v1338_v1, %v1342_v17  ;;  %v1375_v20 = vor.u32 %v1374_v40, %v1371_v49  ;;  %v1357_v27 = vsel %vm3739_vm4, %v1352_v2, %v1356_v4  ;;  %v1388_v37 = vshll.u32 %v4160_v11, 16  ;;  %v2987_v4 = vld [vmem:[%s3698_s28 + $0x24] sm:$0xe]  ;;  %v2989_v7 = vld [vmem:[%s3698_s28 + $0x3c] sm:$0xe] }
  0x72   : > { %v1367_v31 = vsel %vm3739_vm4, %v1362_v54, %v1366_v13  ;;  %v1385_v38 = vor.u32 %v1384_v23, %v1380_v10  ;;  %v2974_v14 = vcombine.low %v1333_v16, %v1343_v6  ;;  %v1592_v58 = vrot.slane %v3965_v62, 5  ;;  %v2990_v13 = vld [vmem:[%s3698_s28 + $0x48] sm:$0xe]  ;;  %v3053_v49 = vld [vmem:[%s3698_s28 + $0x18] sm:$0xf]  ;;  %v3481_v6 = vld [vmem:[%s3698_s28 + $0x60] sm:$0xff]  }
  0x73   : > { %3297 = vmatmul.mubr.msk.bf16.gmra.mxu0 %vm435_vm3, %v2972_v53  ;;  %v2975_v24 = vcombine.low %v1357_v27, %v1367_v31  ;;  %v1376_v41 = vrot.slane %v1375_v20, 4  ;;  %v1390_v19 = vrot.slane %v1388_v37, 5  ;;  %v1599_v45 = vrot.slane %v3984_v60, 5 }
  0x74   : > { %3300 = vmatprep.mubr.msk.bf16.mxu0 %vm435_vm3, %v2973_v28  ;;  %v1386_v29 = vrot.slane %v1385_v38, 4  ;;  %v1606_v50 = vrot.slane %v4013_v35, 5  ;;  %v2993_v52 = vrot.slane %v2985_v33, 9  ;;  %v1594_v47 = vrot.slane %v1592_v58, 4 }
  0x75   : > { %v1595_v62 = vrot.slane %v3968_v48, 5  ;;  %v2994_v55 = vrot.slane %v2986_v46, 9  ;;  %v1381_v32 = vsel %vm3739_vm4, %v1376_v41, %v1380_v10  ;;  %v1601_v35 = vrot.slane %v1599_v45, 4  ;;  %v4230_v10 = vld [vmem:[%s3698_s28 + $0x1c] sm:$0xf] }
  0x76   : > { %v1391_v60 = vsel %vm3739_vm4, %v1386_v29, %v1390_v19  ;;  %v1602_v44 = vrot.slane %v4007_v22, 5  ;;  %v2995_v15 = vrot.slane %v2987_v4, 9  ;;  %v1608_v59 = vrot.slane %v1606_v50, 4  ;;  %v3056_v29 = vld [vmem:[%s3698_s28 + $0x24] sm:$0xf]  ;;  %v3484_v4 = vld [vmem:[%s3698_s28 + $0x30] sm:$0xff]  }
  0x77   : > { %3279 = vmatmul.mubr.msk.bf16.gmra.mxu1 %vm435_vm3, %v3477_v8  ;;  %v1609_v48 = vrot.slane %v4019_v42, 5  ;;  %v1613_v3 = vrot.slane %v4040_v34, 5  ;;  %v2976_v53 = vcombine.low %v1381_v32, %v1391_v60  ;;  %v1593_v28 = vsel %vm3875_vm7, %v2993_v52, %v1592_v58  ;;  %v3482_v42 = vld [vmem:[%s3698_s28 + $0x18] sm:$0xff]  }
  0x78   : > { %3282 = vmatprep.mubr.msk.bf16.mxu1 %vm435_vm3, %v3478_v26  ;;  %v1596_v22 = vsel %vm3875_vm7, %v1594_v47, %v1595_v62  ;;  %v4205_v61 = vsel %vm460_vm0, %v3077_v0, 0  ;;  %v4211_v34 = vsel %vm3875_vm7, %v2994_v55, %v1599_v45  ;;  %v4215_v17 = vsel %vm3875_vm7, %v1601_v35, %v1602_v44  ;;  %v4274_v55 = vld [vmem:[%s3698_s28 + $0x28] sm:$0xf] }
  0x79   : > { %v2535_v1 = vsel %vm460_vm0, %v4139_v51, 0  ;;  %v4223_v0 = vsel %vm3875_vm7, %v2995_v15, %v1606_v50  ;;  %v4227_v40 = vsel %vm3875_vm7, %v1608_v59, %v1609_v48  ;;  %v2996_v2 = vrot.slane %v2988_v63, 9  ;;  %v3055_v15 = vld [vmem:[%s3698_s28 + $0x20] sm:$0x1] }
  0x7a   : > { %v2997_v54 = vrot.slane %v2989_v7, 9  ;;  %v3002_v23 = vcombine.low %v1593_v28, %v1596_v22  ;;  %v1615_v8 = vrot.slane %v1613_v3, 4  ;;  %v1616_v16 = vrot.slane %v4052_v9, 5 }
  0x7b   : > { %3301 = vmatmul.mubr.msk.bf16.gmra.mxu0 %vm435_vm3, %v2974_v14  ;;  %v1620_v51 = vrot.slane %v4059_v25, 5  ;;  %v3003_v20 = vcombine.low %v4211_v34, %v4215_v17  ;;  %v2998_v26 = vrot.slane %v2990_v13, 9  ;;  %v2039_v27 = vshrl.u32 %v3053_v49, 16  ;;  %v2991_v25 = vld [vmem:[%s3698_s28 + $0x54] sm:$0xe] }
  0x7c   : > { %3304 = vmatprep.mubr.msk.bf16.mxu0 %vm435_vm3, %v2975_v24  ;;  %v2042_v31 = vshll.u32 %v3053_v49, 16  ;;  %v3004_v38 = vcombine.low %v4223_v0, %v4227_v40  ;;  %v1623_v9 = vrot.slane %v4065_v36, 5  ;;  %v2048_v37 = vshll.u32 %v4230_v10, 16  ;;  %v3483_v36 = vld [vmem:[%s3698_s28 + $0x24] sm:$0xff]  }
  0x7d   : > { %v2052_v14 = vshrl.u32 %v4230_v10, 16  ;;  %v4247_v24 = vsel %vm3875_vm7, %v2996_v2, %v1613_v3  ;;  %v4251_v33 = vsel %vm3875_vm7, %v2997_v54, %v1620_v51  ;;  %v1627_v58 = vrot.slane %v4080_v57, 5  ;;  %v3095_v17 = vld [vmem:[%s3698_s28 + $0x24] sm:$0xe] }
  0x7e   : > { %v1634_v41 = vrot.slane %v4104_v12, 5  ;;  %v4259_v19 = vsel %vm3875_vm7, %v1615_v8, %v1616_v16  ;;  %v1622_v46 = vrot.slane %v1620_v51, 4  ;;  %v1630_v45 = vrot.slane %v4107_v18, 5 }
  0x7f   : > { %3283 = vmatmul.mubr.msk.bf16.gmra.mxu1 %vm435_vm3, %v3479_v5  ;;  %v1641_v50 = vrot.slane %v4132_v43, 5  ;;  %v4267_v57 = vsel %vm3875_vm7, %v2998_v26, %v1627_v58  ;;  %v2999_v12 = vrot.slane %v2991_v25, 9  ;;  %v2992_v5 = vld [vmem:[%s3698_s28 + $0x60] sm:$0xe]  ;;  %v2041_v52 = vrot.slane %v2039_v27, 4 }
  0x80   : > { %3286 = vmatprep.mubr.msk.bf16.mxu1 %vm435_vm3, %v3480_v56  ;;  %v2044_v47 = vrot.slane %v2042_v31, 5  ;;  %v4271_v62 = vrot.slane %v2048_v37, 5  ;;  %v2054_v18 = vrot.slane %v2052_v14, 4  ;;  %v2063_v43 = vshrl.u32 %v3056_v29, 16  ;;  %v3059_v26 = vld [vmem:[%s3698_s28 + $0x30] sm:$0xf] }
  0x81   : > { %v2066_v56 = vshll.u32 %v3056_v29, 16  ;;  %v3005_v32 = vcombine.low %v4247_v24, %v4259_v19  ;;  %v1629_v60 = vrot.slane %v1627_v58, 4  ;;  %v1636_v35 = vrot.slane %v1634_v41, 4  ;;  %v4319_v27 = vld [vmem:[%s3698_s28 + $0x34] sm:$0xf]  ;;  %v3485_v31 = vld [vmem:[%s3698_s28 + $0x3c] sm:$0xff]  }
  0x82   : > { %v1637_v44 = vrot.slane %v4122_v39, 5  ;;  %v4282_v59 = vsel %vm3875_vm7, %v1622_v46, %v1623_v9  ;;  %v3000_v48 = vrot.slane %v2992_v5, 9  ;;  %v1643_v63 = vrot.slane %v1641_v50, 4 }
  0x83   : > { %3305 = vmatmul.mubr.msk.bf16.gmra.mxu0 %vm435_vm3, %v2976_v53  ;;  %v1644_v3 = vrot.slane %v4160_v11, 5  ;;  %v2045_v7 = vor.u32 %v2044_v47, %v2041_v52  ;;  %v3094_v53 = vld [vmem:[%s3698_s28 + $0x18] sm:$0xe]  ;;  %v2430_v28 = vrot.slane %v4230_v10, 5  ;;  %v2072_v22 = vshll.u32 %v4274_v55, 16 }
  0x84   : > { %3328 = vmatprep.mubr.msk.bf16.mxu0 %vm435_vm3, %v3482_v42  ;;  %v2076_v39 = vshrl.u32 %v4274_v55, 16  ;;  %v2055_v42 = vor.u32 %v2054_v18, %v4271_v62  ;;  %v2058_v11 = vshll.u32 %v3055_v15, 16  ;;  %v2065_v13 = vrot.slane %v2063_v43, 4  ;;  %v3062_v52 = vld [vmem:[%s3698_s28 + $0x3c] sm:$0xf] }
  0x85   : > { %v2068_v49 = vrot.slane %v2066_v56, 5  ;;  %v3006_v2 = vcombine.low %v4251_v33, %v4282_v59  ;;  %v4296_v54 = vsel %vm3875_vm7, %v1629_v60, %v1630_v45  ;;  %v4300_v10 = vsel %vm3875_vm7, %v2999_v12, %v1634_v41  ;;  %v3486_v33 = vld [vmem:[%s3698_s28 + $0x48] sm:$0xff]   ;;  %v3061_v60 = vld [vmem:[%s3698_s28 + $0x38] sm:$0x1] }
  0x86   : > { %v4311_v8 = vsel %vm3875_vm7, %v3000_v48, %v1641_v50  ;;  %v4315_v16 = vsel %vm3875_vm7, %v1643_v63, %v1644_v3  ;;  %v3102_v51 = vrot.slane %v3094_v53, 9  ;;  %v2046_v9 = vrot.slane %v2045_v7, 4  ;;  %v3096_v48 = vld [vmem:[%s3698_s28 + $0x30] sm:$0xe]  ;;  %v3487_v53 = vld [vmem:[%s3698_s28 + $0x54] sm:$0xff]  }
  0x87   : > { %3287 = vmatmul.mubr.msk.bf16.gmra.mxu1 %vm435_vm3, %v3481_v6  ;;  %v2433_v6 = vrot.slane %v3055_v15, 5  ;;  %v2432_v25 = vrot.slane %v2430_v28, 4  ;;  %v4326_v37 = vrot.slane %v2072_v22, 5  ;;  %v2078_v14 = vrot.slane %v2076_v39, 4 }
  0x88   : > { %3310 = vmatprep.mubr.msk.bf16.mxu1 %vm435_vm3, %v3002_v23  ;;  %v4307_v23 = vld [vmem:[%s3698_s28 + $0x2c] sm:$0x1]  ;;  %v2056_v58 = vrot.slane %v2055_v42, 4  ;;  %v2060_v41 = vrot.slane %v2058_v11, 5  ;;  %v2069_v29 = vor.u32 %v2068_v49, %v2065_v13  ;;  %v2096_v46 = vshll.u32 %v4319_v27, 16  ;;  %v3488_v11 = vld [vmem:[%s3698_s28 + $0x60] sm:$0xff]  }
  0x89   : > { %v2082_v34 = vshll.u32 %v4307_v23, 16  ;;  %v2100_v45 = vshrl.u32 %v4319_v27, 16  ;;  %v3009_v40 = vcombine.low %v4311_v8, %v4315_v16  ;;  %v2051_v50 = vsel %vm3739_vm4, %v2046_v9, %v4271_v62  ;;  %v4363_v62 = vld [vmem:[%s3698_s28 + $0x40] sm:$0xf] }
  0x8a   : > { %v2079_v12 = vor.u32 %v2078_v14, %v4326_v37  ;;  %v2437_v5 = vrot.slane %v4274_v55, 5  ;;  %v2061_v47 = vsel %vm3739_vm4, %v2056_v58, %v2060_v41  ;;  %v2070_v18 = vrot.slane %v2069_v29, 4  ;;  %v3097_v29 = vld [vmem:[%s3698_s28 + $0x3c] sm:$0xe] }
  0x8b   : > { %3329 = vmatmul.mubr.msk.bf16.vlgmr.msra.gmra.mxu0 %vm435_vm3, %v3483_v36  ;;  %v2090_v36 = vshll.u32 %v3059_v26, 16  ;;  %v2084_v43 = vrot.slane %v2082_v34, 5  ;;  %v3103_v56 = vrot.slane %v3095_v17, 9  ;;  %v4366_v15 = vrot.slane %v2096_v46, 5 }
  0x8c   : > { %3363 = vmatpush3.bf16.msra.mxu0 %v2535_v1  ;;  %3332 = vmatprep.mubr.msk.bf16.mxu0 %vm435_vm3, %v3484_v4  ;;  %v4304_v1 = vsel %vm3875_vm7, %v1636_v35, %v1637_v44  ;;  %v4354_v4 = vsel %vm3875_vm7, %v2432_v25, %v2433_v6  ;;  %v2102_v59 = vrot.slane %v2100_v45, 4  ;;  %v2440_v55 = vrot.slane %v4307_v23, 5  ;;  %v3065_v6 = vld [vmem:[%s3698_s28 + $0x48] sm:$0xf] }
  0x8d   : > { %v3008_v0 = vcombine.low %v4300_v10, %v4304_v1  ;;  %v2092_v44 = vrot.slane %v2090_v36, 5  ;;  %v2444_v63 = vrot.slane %v4319_v27, 5  ;;  %v2111_v3 = vshrl.u32 %v3062_v52, 16 }
  0x8e   : > { %v2114_v7 = vshll.u32 %v3062_v52, 16  ;;  %v2439_v22 = vrot.slane %v2437_v5, 4  ;;  %v2120_v39 = vshll.u32 %v4363_v62, 16  ;;  %v2124_v42 = vshrl.u32 %v4363_v62, 16 }
  0x8f   : > { %3311 = vmatmul.mubr.msk.bf16.vlgmr.msra.gmra.mxu1 %vm435_vm3, %v3003_v20  ;;  %v2087_v20 = vshrl.u32 %v3059_v26, 16  ;;  %v4380_v13 = vcombine.low %v2051_v50, %v2061_v47  ;;  %v2075_v24 = vsel %vm3739_vm4, %v2070_v18, %v4326_v37  ;;  %v4389_v19 = vsel %vm3875_vm7, %v3103_v56, %v2437_v5  ;;  %v4394_v26 = vld [vmem:[%s3698_s28 + $0x4c] sm:$0xf] }
  0x90   : > { %3345 = vmatpush3.bf16.msra.mxu1 %v4205_v61  ;;  %3314 = vmatprep.mubr.msk.bf16.mxu1 %vm435_vm3, %v3004_v38  ;;  %v3007_v61 = vcombine.low %v4267_v57, %v4296_v54  ;;  %v4346_v38 = vsel %vm3875_vm7, %v3102_v51, %v2430_v28  ;;  %v2080_v28 = vrot.slane %v2079_v12, 4  ;;  %v2103_v23 = vor.u32 %v2102_v59, %v4366_v15  ;;  %v3489_v47 = vld [vmem:[%s3698_s28 + $0x6c] sm:$0xff]  }
  0x91   : > { %v2089_v35 = vrot.slane %v2087_v20, 4  ;;  %v3111_v49 = vcombine.low %v4346_v38, %v4354_v4  ;;  %v3104_v51 = vrot.slane %v3096_v48, 9  ;;  %v2446_v27 = vrot.slane %v2444_v63, 4 }
  0x92   : > { %v2113_v9 = vrot.slane %v2111_v3, 4  ;;  %v2116_v25 = vrot.slane %v2114_v7, 5  ;;  %v2085_v37 = vsel %vm3739_vm4, %v2080_v28, %v2084_v43  ;;  %v4401_v14 = vsel %vm3875_vm7, %v2439_v22, %v2440_v55  ;;  %v3068_v55 = vld [vmem:[%s3698_s28 + $0x54] sm:$0xf] }
  0x93   : > { %3333 = vmatmul.mubr.msk.bf16.gmra.mxu0 %vm435_vm3, %v3485_v31  ;;  %v2447_v31 = vrot.slane %v3061_v60, 5  ;;  %v4404_v58 = vrot.slane %v2120_v39, 5  ;;  %v2126_v41 = vrot.slane %v2124_v42, 4  ;;  %v2135_v34 = vshrl.u32 %v3065_v6, 16  ;;  %v3071_v42 = vld [vmem:[%s3698_s28 + $0x60] sm:$0xf] }
  0x94   : > { %3336 = vmatprep.mubr.msk.bf16.mxu0 %vm435_vm3, %v3486_v33  ;;  %v3064_v33 = vld [vmem:[%s3698_s28 + $0x44] sm:$0x1]  ;;  %v2138_v17 = vshll.u32 %v3065_v6, 16  ;;  %v2144_v20 = vshll.u32 %v4394_v26, 16  ;;  %v2148_v36 = vshrl.u32 %v4394_v26, 16  ;;  %v4412_v45 = vrot.slane %v2103_v23, 4 }
  0x95   : > { %v4418_v50 = vsel %vm3875_vm7, %v3104_v51, %v2444_v63  ;;  %v4422_v4 = vsel %vm3875_vm7, %v2446_v27, %v2447_v31  ;;  %v2117_v12 = vor.u32 %v2116_v25, %v2113_v9  ;;  %v2130_v5 = vshll.u32 %v3064_v33, 16  ;;  %v4467_v23 = vld [vmem:[%s3698_s28 + $0x64] sm:$0xf] }
  0x96   : > { %v2451_v52 = vrot.slane %v4363_v62, 5  ;;  %v4430_v18 = vcombine.low %v2075_v24, %v2085_v37  ;;  %v3112_v43 = vcombine.low %v4389_v19, %v4401_v14  ;;  %v2127_v56 = vor.u32 %v2126_v41, %v4404_v58 }
  0x97   : > { %3315 = vmatmul.mubr.msk.bf16.gmra.mxu1 %vm435_vm3, %v3005_v32  ;;  %v2093_v32 = vor.u32 %v2092_v44, %v2089_v35  ;;  %v3067_v35 = vld [vmem:[%s3698_s28 + $0x50] sm:$0x1]  ;;  %v2137_v57 = vrot.slane %v2135_v34, 4  ;;  %v2140_v54 = vrot.slane %v2138_v17, 5  ;;  %v2150_v62 = vrot.slane %v2148_v36, 4 }
  0x98   : > { %3318 = vmatprep.mubr.msk.bf16.mxu1 %vm435_vm3, %v3006_v2  ;;  %v2106_v2 = vshll.u32 %v3061_v60, 16  ;;  %v3105_v60 = vrot.slane %v3097_v29, 9  ;;  %v3098_v44 = vld [vmem:[%s3698_s28 + $0x48] sm:$0xe]  ;;  %v3113_v1 = vcombine.low %v4418_v50, %v4422_v4  ;;  %v2118_v48 = vrot.slane %v2117_v12, 4 }
  0x99   : > { %v4410_v46 = vrot.slane %v2093_v32, 4  ;;  %v2132_v63 = vrot.slane %v2130_v5, 5  ;;  %v2453_v3 = vrot.slane %v2451_v52, 4  ;;  %v2454_v7 = vrot.slane %v3064_v33, 5  ;;  %v3070_v29 = vld [vmem:[%s3698_s28 + $0x5c] sm:$0x1] }
  0x9a   : > { %v4414_v38 = vrot.slane %v2106_v2, 5  ;;  %v4461_v28 = vsel %vm3875_vm7, %v3105_v60, %v2451_v52  ;;  %v2154_v22 = vshll.u32 %v3067_v35, 16  ;;  %v3106_v39 = vrot.slane %v3098_v44, 9  ;;  %v3073_v12 = vld [vmem:[%s3698_s28 + $0x68] sm:$0x1] }
  0x9b   : > { %3337 = vmatmul.mubr.msk.bf16.gmra.mxu0 %vm435_vm3, %v3487_v53  ;;  %v2099_v59 = vsel %vm3739_vm4, %v4410_v46, %v4366_v15  ;;  %v4456_v53 = vld [vmem:[%s3698_s28 + $0x58] sm:$0xf]  ;;  %v2128_v15 = vrot.slane %v2127_v56, 4  ;;  %v2461_v19 = vrot.slane %v3067_v35, 5  ;;  %v2159_v32 = vshrl.u32 %v3068_v55, 16 }
  0x9c   : > { %3340 = vmatprep.mubr.msk.bf16.mxu0 %vm435_vm3, %v3488_v11  ;;  %v2109_v10 = vsel %vm3739_vm4, %v4412_v45, %v4414_v38  ;;  %v2141_v11 = vor.u32 %v2140_v54, %v2137_v57  ;;  %v2162_v51 = vshll.u32 %v3068_v55, 16  ;;  %v2168_v6 = vshll.u32 %v4456_v53, 16  ;;  %v3099_v46 = vld [vmem:[%s3698_s28 + $0x54] sm:$0xe]  ;;  %v3074_v57 = vld [vmem:[%s3698_s28 + $0x6c] sm:$0xf] }
  0x9d   : > { %v2123_v27 = vsel %vm3739_vm4, %v2118_v48, %v4404_v58  ;;  %v2183_v31 = vshrl.u32 %v3071_v42, 16  ;;  %v2186_v9 = vshll.u32 %v3071_v42, 16  ;;  %v2133_v25 = vsel %vm3739_vm4, %v2128_v15, %v2132_v63 }
  0x9e   : > { %v2156_v37 = vrot.slane %v2154_v22, 5  ;;  %v2192_v14 = vshll.u32 %v4467_v23, 16  ;;  %v2196_v33 = vshrl.u32 %v4467_v23, 16  ;;  %v2142_v58 = vrot.slane %v2141_v11, 4 }
  0x9f   : > { %3319 = vmatmul.mubr.msk.bf16.gmra.mxu1 %vm435_vm3, %v3007_v61  ;;  %v4440_v61 = vrot.slane %v2144_v20, 5  ;;  %v2161_v16 = vrot.slane %v2159_v32, 4  ;;  %v2164_v34 = vrot.slane %v2162_v51, 5  ;;  %v4493_v17 = vrot.slane %v2168_v6, 5  ;;  %v3076_v6 = vld [vmem:[%s3698_s28 + $0x74] sm:$0x1] }
  0xa0   : > { %3322 = vmatprep.mubr.msk.bf16.mxu1 %vm435_vm3, %v3008_v0  ;;  %v2458_v0 = vrot.slane %v4394_v26, 5  ;;  %v2172_v26 = vshrl.u32 %v4456_v53, 16  ;;  %v3080_v36 = vcombine.low %v2099_v59, %v2109_v10  ;;  %v2185_v45 = vrot.slane %v2183_v31, 4  ;;  %v3075_v10 = vld [vmem:[%s3698_s28 + $0x70] sm:$0xf] }
  0xa1   : > { %v2151_v24 = vor.u32 %v2150_v62, %v4440_v61  ;;  %v2188_v38 = vrot.slane %v2186_v9, 5  ;;  %v3081_v50 = vcombine.low %v2123_v27, %v2133_v25  ;;  %v4501_v5 = vrot.slane %v2192_v14, 5  ;;  %v3101_v25 = vld [vmem:[%s3698_s28 + $0x6c] sm:$0xe] }
  0xa2   : > { %v2460_v2 = vrot.slane %v2458_v0, 4  ;;  %v2459_v8 = vsel %vm3875_vm7, %v3106_v39, %v2458_v0  ;;  %v2174_v20 = vrot.slane %v2172_v26, 4  ;;  %v2198_v52 = vrot.slane %v2196_v33, 4 }
  0xa3   : > { %3341 = vmatmul.mubr.msk.bf16.gmra.mxu0 %vm435_vm3, %v3489_v47  ;;  %v2152_v41 = vrot.slane %v2151_v24, 4  ;;  %v2147_v47 = vsel %vm3739_vm4, %v2142_v58, %v4440_v61  ;;  %v2472_v35 = vrot.slane %v4467_v23, 5  ;;  %v2165_v54 = vor.u32 %v2164_v34, %v2161_v16 }
  0xa4   : > { %3364 = vmatprep.mubr.msk.bf16.mxu0 %vm435_vm3, %v3111_v49  ;;  %v4476_v49 = vsel %vm3875_vm7, %v2453_v3, %v2454_v7  ;;  %v2175_v62 = vor.u32 %v2174_v20, %v4493_v17  ;;  %v2178_v44 = vshll.u32 %v3070_v29, 16  ;;  %v3107_v59 = vrot.slane %v3099_v46, 9 }
  0xa5   : > { %v3114_v4 = vcombine.low %v4461_v28, %v4476_v49  ;;  %v2157_v56 = vsel %vm3739_vm4, %v2152_v41, %v2156_v37  ;;  %v2189_v55 = vor.u32 %v2188_v38, %v2185_v45  ;;  %v2202_v48 = vshll.u32 %v3073_v12, 16 }
  0xa6   : > { %v2199_v61 = vor.u32 %v2198_v52, %v4501_v5  ;;  %v2207_v3 = vshrl.u32 %v3074_v57, 16  ;;  %v2210_v7 = vshll.u32 %v3074_v57, 16  ;;  %v2475_v15 = vrot.slane %v3073_v12, 5 }
  0xa7   : > { %3323 = vmatmul.mubr.msk.bf16.gmra.mxu1 %vm435_vm3, %v3009_v40  ;;  %v2462_v40 = vsel %vm3875_vm7, %v2460_v2, %v2461_v19  ;;  %v2216_v28 = vshll.u32 %v3075_v10, 16  ;;  %v2220_v22 = vshrl.u32 %v3075_v10, 16  ;;  %v3082_v39 = vcombine.low %v2147_v47, %v2157_v56 }
  0xa8   : > { %3346 = vmatprep.mubr.msk.bf16.mxu1 %vm435_vm3, %v4380_v13  ;;  %v2465_v13 = vrot.slane %v4456_v53, 5  ;;  %v3115_v60 = vcombine.low %v2459_v8, %v2462_v40  ;;  %v2474_v53 = vrot.slane %v2472_v35, 4  ;;  %v2166_v42 = vrot.slane %v2165_v54, 4 }
  0xa9   : > { %v2176_v11 = vrot.slane %v2175_v62, 4  ;;  %v2180_v24 = vrot.slane %v2178_v44, 5  ;;  %v2190_v32 = vrot.slane %v2189_v55, 4  ;;  %v2204_v23 = vrot.slane %v2202_v48, 5 }
  0xaa   : > { %v2467_v0 = vrot.slane %v2465_v13, 4  ;;  %v2200_v2 = vrot.slane %v2199_v61, 4  ;;  %v2209_v26 = vrot.slane %v2207_v3, 4  ;;  %v2212_v27 = vrot.slane %v2210_v7, 5 }
  0xab   : > { %3365 = vmatmul.mubr.msk.bf16.vlgmr.msra.gmra.mxu0 %vm435_vm3, %v3112_v43  ;;  %v3100_v43 = vld [vmem:[%s3698_s28 + $0x60] sm:$0xe]  ;;  %v2476_v49 = vsel %vm3875_vm7, %v2474_v53, %v2475_v15  ;;  %v2218_v31 = vrot.slane %v2216_v28, 5  ;;  %v2222_v9 = vrot.slane %v2220_v22, 4  ;;  %v2479_v37 = vrot.slane %v3075_v10, 5  ;;  %s3494_s28 = sshll.u32 %s3584_s24, 4  ;;  %s3495_s28 = int_to_ptr.vmem [resolvable:$false] %s3494_s28 }
  0xac   : > { %3368 = vmatprep.mubr.msk.bf16.mxu0 %vm435_vm3, %v3113_v1  ;;  %v2468_v1 = vrot.slane %v3070_v29, 5  ;;  %v3108_v63 = vrot.slane %v3100_v43, 9  ;;  %v2171_v14 = vsel %vm3739_vm4, %v2166_v42, %v4493_v17  ;;  %v2181_v33 = vsel %vm3739_vm4, %v2176_v11, %v2180_v24  ;;  %s3496_s29 = scalar_lea.vmem %s3495_s28, 4096  ;;  %p3497_p2 = scmp.lt.s32.totalorder %s4825_s8, %s3495_s28 }
  0xad   : > { %v2195_v41 = vsel %vm3739_vm4, %v2190_v32, %v4501_v5  ;;  %v2205_v8 = vsel %vm3739_vm4, %v2200_v2, %v2204_v23  ;;  %v2226_v40 = vshll.u32 %v3076_v6, 16  ;;  %v3109_v29 = vrot.slane %v3101_v25, 9  ;;  %p3498_p4 = scmp.lt.s32.totalorder %s3496_s29, %s3490_s21 }
  0xae   : > { %v2469_v19 = vsel %vm3875_vm7, %v2467_v0, %v2468_v1  ;;  %v2473_v51 = vsel %vm3875_vm7, %v3108_v63, %v2472_v35  ;;  %v2213_v34 = vor.u32 %v2212_v27, %v2209_v26  ;;  %v2223_v17 = vor.u32 %v2222_v9, %v2218_v31 }
  0xaf   : > { %3347 = vmatmul.mubr.msk.bf16.vlgmr.msra.gmra.mxu1 %vm435_vm3, %v4430_v18  ;;  %v2466_v18 = vsel %vm3875_vm7, %v3107_v59, %v2465_v13  ;;  %v3117_v16 = vcombine.low %v2473_v51, %v2476_v49  ;;  %v2481_v20 = vrot.slane %v2479_v37, 4  ;;  %v3083_v46 = vcombine.low %v2171_v14, %v2181_v33  ;;  %p3499_p5 = por %p3498_p4, %p3497_p2 }
  0xb0   : > { %3350 = vmatprep.mubr.msk.bf16.mxu1 %vm435_vm3, %v3080_v36  ;;  %v3116_v58 = vcombine.low %v2466_v18, %v2469_v19  ;;  %v2482_v36 = vrot.slane %v3076_v6, 5  ;;  %v3084_v13 = vcombine.low %v2195_v41, %v2205_v8  ;;  %v2228_v45 = vrot.slane %v2226_v40, 5 }
  0xb1   : > { %v2214_v38 = vrot.slane %v2213_v34, 4  ;;  %p3500_p6 = pnand %p3499_p5, %p3493_p1 }
  0xb2   : > { %v2483_v12 = vsel %vm3875_vm7, %v2481_v20, %v2482_v36 }
  0xb3   : > { %3369 = vmatmul.mubr.msk.bf16.gmra.mxu0 %vm435_vm3, %v3114_v4  ;;  %v2480_v4 = vsel %vm3875_vm7, %v3109_v29, %v2479_v37  ;;  %v2219_v52 = vsel %vm3739_vm4, %v2214_v38, %v2218_v31 }
  0xb4   : > { %3372 = vmatprep.mubr.msk.bf16.mxu0 %vm435_vm3, %v3115_v60  ;;  %v3118_v5 = vcombine.low %v2480_v4, %v2483_v12 }
  0xb7   : > { %3351 = vmatmul.mubr.msk.bf16.gmra.mxu1 %vm435_vm3, %v3081_v50  ;;  %v2224_v50 = vrot.slane %v2223_v17, 4 }
  0xb8   : > { %3354 = vmatprep.mubr.msk.bf16.mxu1 %vm435_vm3, %v3082_v39 }
  0xb9   : > { %v2229_v47 = vsel %vm3739_vm4, %v2224_v50, %v2228_v45 }
  0xba   : > { %v3085_v56 = vcombine.low %v2219_v52, %v2229_v47 }
  0xbb   : > { %3373 = vmatmul.mubr.msk.bf16.gmra.mxu0 %vm435_vm3, %v3116_v58 }
  0xbc   : > { %3376 = vmatprep.mubr.msk.bf16.mxu0 %vm435_vm3, %v3117_v16 }
  0xbf   : > { %3355 = vmatmul.mubr.msk.bf16.gmra.mxu1 %vm435_vm3, %v3083_v46 }
  0xc0   : > { %3358 = vmatprep.mubr.msk.bf16.mxu1 %vm435_vm3, %v3084_v13 }
  0xc3   : > { %3377 = vmatmul.mubr.msk.bf16.gmra.mxu0 %vm435_vm3, %v3118_v5 }
  0xc7   : > { %3359 = vmatmul.mubr.msk.bf16.gmra.mxu1 %vm435_vm3, %v3085_v56 }
  0xf2   : > { %v3222_v60 = vpop.f32.mrf.mxu0 }
  0xf4   : > { %v498_v21 = vpop.f32.mrf.mxu0 }
  0xf6   : > { %v3223_v57 = vpop.f32.mrf.mxu0 }
  0xf7   : > { %v3230_v43 = vpop.f32.mrf.mxu1 }
  0xf8   : > { %v501_v62 = vpop.f32.mrf.mxu0 }
  0xf9   : > { %v530_v35 = vpop.f32.mrf.mxu1 }
  0xfb   : > { %v3231_v54 = vpop.f32.mrf.mxu1 }
  0xfd   : > { %v533_v44 = vpop.f32.mrf.mxu1 }
 0x103   : > { %v3226_v59 = vpop.f32.mrf.mxu0 }
 0x105   : > { %v514_v10 = vpop.f32.mrf.mxu0 }
 0x107   : > { %v3234_v0 = vpop.f32.mrf.mxu1  ;;  %v3227_v1 = vpop.f32.mrf.mxu0 }
 0x109   : > { %v546_v55 = vpop.f32.mrf.mxu1  ;;  %v517_v30 = vpop.f32.mrf.mxu0 }
 0x10b   : > { %v3235_v48 = vpop.f32.mrf.mxu1  ;;  %v3258_v61 = vpop.f32.mrf.mxu0 }
 0x10d   : > { %v4556_v63 = vpop.f32.mrf.mxu1  ;;  %v895_v3 = vpop.f32.mrf.mxu0 }
 0x10f   : > { %v3240_v7 = vpop.f32.mrf.mxu1  ;;  %v3259_v53 = vpop.f32.mrf.mxu0 }
 0x110   : > { %v671_v15 = vadd.f32 %v3240_v7, %v3222_v60 }
 0x111   : > { %v662_v28 = vpop.f32.mrf.mxu1  ;;  %v898_v22 = vpop.f32.mrf.mxu0 }
 0x112   : > { %v4558_v39 = vadd.f32 %v3258_v61, %v671_v15  ;;  %v663_v42 = vadd.f32 %v662_v28, %v498_v21 }
 0x113   : > { %v3241_v11 = vpop.f32.mrf.mxu1  ;;  %v3262_v24 = vpop.f32.mrf.mxu0 }
 0x114   : > { %v4560_v18 = vadd.f32 %v895_v3, %v663_v42  ;;  %v674_v19 = vadd.f32 %v3241_v11, %v3223_v57 }
 0x115   : > { %v665_v32 = vpop.f32.mrf.mxu1  ;;  %v911_v23 = vpop.f32.mrf.mxu0 }
 0x116   : > { %v4562_v2 = vadd.f32 %v3259_v53, %v674_v19  ;;  %v666_v51 = vadd.f32 %v665_v32, %v501_v62 }
 0x117   : > { %v3244_v6 = vpop.f32.mrf.mxu1  ;;  %v3263_v26 = vpop.f32.mrf.mxu0 }
 0x118   : > { %v4564_v27 = vadd.f32 %v898_v22, %v666_v51  ;;  %v687_v49 = vadd.f32 %v3244_v6, %v3226_v59 }
 0x119   : > { %v678_v31 = vpop.f32.mrf.mxu1  ;;  %v914_v9 = vpop.f32.mrf.mxu0 }
 0x11a   : > { %v4566_v25 = vadd.f32 %v3262_v24, %v687_v49  ;;  %v679_v37 = vadd.f32 %v678_v31, %v514_v10 }
 0x11b   : > { %v3245_v14 = vpop.f32.mrf.mxu1  ;;  %v3266_v33 = vpop.f32.mrf.mxu0 }
 0x11c   : > { %v4568_v58 = vadd.f32 %v911_v23, %v679_v37  ;;  %v690_v41 = vadd.f32 %v3245_v14, %v3227_v1 }
 0x11d   : > { %v681_v8 = vpop.f32.mrf.mxu1  ;;  %v927_v16 = vpop.f32.mrf.mxu0 }
 0x11e   : > { %v4570_v40 = vadd.f32 %v3263_v26, %v690_v41  ;;  %v682_v29 = vadd.f32 %v681_v8, %v517_v30 }
 0x11f   : > { %v3248_v34 = vpop.f32.mrf.mxu1  ;;  %v3267_v17 = vpop.f32.mrf.mxu0 }
 0x120   : > { %v4572_v20 = vadd.f32 %v914_v9, %v682_v29  ;;  %v703_v36 = vadd.f32 %v3248_v34, %v3230_v43 }
 0x121   : > { %v694_v46 = vpop.f32.mrf.mxu1  ;;  %v930_v13 = vpop.f32.mrf.mxu0 }
 0x122   : > { %v4574_v45 = vadd.f32 %v3266_v33, %v703_v36  ;;  %v695_v38 = vadd.f32 %v694_v46, %v530_v35 }
 0x123   : > { %v3249_v50 = vpop.f32.mrf.mxu1  ;;  %v3270_v4 = vpop.f32.mrf.mxu0 }
 0x124   : > { %v4576_v12 = vadd.f32 %v927_v16, %v695_v38  ;;  %v706_v5 = vadd.f32 %v3249_v50, %v3231_v54 }
 0x125   : > { %v697_v52 = vpop.f32.mrf.mxu1  ;;  %v943_v47 = vpop.f32.mrf.mxu0 }
 0x126   : > { %v4578_v56 = vadd.f32 %v3267_v17, %v706_v5  ;;  %v698_v60 = vadd.f32 %v697_v52, %v533_v44 }
 0x127   : > { %v3252_v21 = vpop.f32.mrf.mxu1  ;;  %v3271_v57 = vpop.f32.mrf.mxu0 }
 0x128   : > { %v4580_v62 = vadd.f32 %v930_v13, %v698_v60  ;;  %v719_v43 = vadd.f32 %v3252_v21, %v3234_v0 }
 0x129   : > { %v710_v59 = vpop.f32.mrf.mxu1  ;;  %v946_v10 = vpop.f32.mrf.mxu0 }
 0x12a   : > { %v4582_v1 = vadd.f32 %v3270_v4, %v719_v43  ;;  %v711_v35 = vadd.f32 %v710_v59, %v546_v55 }
 0x12b   : > { %v3253_v30 = vpop.f32.mrf.mxu1  ;;  %v4584_v61 = vpop.f32.mrf.mxu0 }
 0x12c   : > { %v4586_v3 = vadd.f32 %v943_v47, %v711_v35  ;;  %v722_v54 = vadd.f32 %v3253_v30, %v3235_v48 }
 0x12d   : > { %v713_v7 = vpop.f32.mrf.mxu1  ;;  %v4588_v53 = vpop.f32.mrf.mxu0 }
 0x12e   : > { %v4590_v44 = vadd.f32 %v3271_v57, %v722_v54  ;;  %v714_v15 = vadd.f32 %v713_v7, %v4556_v63 }
 0x12f   : > { %v3276_v28 = vpop.f32.mrf.mxu1  ;;  %v4593_v0 = vpop.f32.mrf.mxu0 }
 0x130   : > { %v4595_v22 = vadd.f32 %v946_v10, %v714_v15 }
 0x131   : > { %v1097_v42 = vpop.f32.mrf.mxu1  ;;  %v4597_v55 = vpop.f32.mrf.mxu0 }
 0x132   : > { %4894 = vst [vmem:[#allocation5_spill] sm:$0xff] %v4595_v22 }
 0x133   : > { %v3277_v11 = vpop.f32.mrf.mxu1  ;;  %v4599_v24 = vpop.f32.mrf.mxu0 }
 0x135   : > { %v1100_v19 = vpop.f32.mrf.mxu1  ;;  %v4601_v48 = vpop.f32.mrf.mxu0 }
 0x137   : > { %v3280_v32 = vpop.f32.mrf.mxu1  ;;  %v4603_v23 = vpop.f32.mrf.mxu0 }
 0x139   : > { %v1113_v51 = vpop.f32.mrf.mxu1  ;;  %v4605_v6 = vpop.f32.mrf.mxu0 }
 0x13b   : > { %v3281_v63 = vpop.f32.mrf.mxu1  ;;  %v4607_v26 = vpop.f32.mrf.mxu0 }
 0x13d   : > { %v1116_v49 = vpop.f32.mrf.mxu1  ;;  %v4609_v31 = vpop.f32.mrf.mxu0 }
 0x13f   : > { %v3284_v9 = vpop.f32.mrf.mxu1  ;;  %v4611_v37 = vpop.f32.mrf.mxu0 }
 0x141   : > { %v4613_v14 = vpop.f32.mrf.mxu1  ;;  %v4615_v33 = vpop.f32.mrf.mxu0 }
 0x143   : > { %v4617_v41 = vpop.f32.mrf.mxu1  ;;  %v4619_v8 = vpop.f32.mrf.mxu0 }
 0x145   : > { %v4621_v16 = vpop.f32.mrf.mxu1  ;;  %v4623_v29 = vpop.f32.mrf.mxu0 }
 0x147   : > { %v4625_v34 = vpop.f32.mrf.mxu1  ;;  %v4627_v17 = vpop.f32.mrf.mxu0 }
 0x148   : > { %4895 = vst [vmem:[#allocation6_spill] sm:$0xff] %v4627_v17 }
 0x149   : > { %v4629_v36 = vpop.f32.mrf.mxu1  ;;  %v4631_v46 = vpop.f32.mrf.mxu0 }
 0x14a   : > { %4896 = vst [vmem:[#allocation7_spill] sm:$0xff] %v4631_v46 }
 0x14b   : > { %v4633_v13 = vpop.f32.mrf.mxu1  ;;  %v3330_v38 = vpop.f32.mrf.mxu0 }
 0x14d   : > { %v4635_v50 = vpop.f32.mrf.mxu1  ;;  %v1935_v4 = vpop.f32.mrf.mxu0 }
 0x14e   : > { %4897 = vst [vmem:[#allocation8_spill] sm:$0xff] %v4635_v50 }
 0x14f   : > { %v3312_v5 = vpop.f32.mrf.mxu1  ;;  %v4637_v52 = vpop.f32.mrf.mxu0 }
 0x151   : > { %v1733_v47 = vpop.f32.mrf.mxu1  ;;  %v4639_v60 = vpop.f32.mrf.mxu0 }
 0x152   : > { %4898 = vst [vmem:[#allocation9_spill] sm:$0xff] %v4639_v60 }
 0x153   : > { %v3313_v21 = vpop.f32.mrf.mxu1  ;;  %v4641_v57 = vpop.f32.mrf.mxu0 }
 0x154   : > { %4899 = vst [vmem:[#allocation10_spill] sm:$0xff] %v4641_v57 }
 0x155   : > { %v1736_v43 = vpop.f32.mrf.mxu1  ;;  %v4643_v59 = vpop.f32.mrf.mxu0 }
 0x156   : > { %4900 = vst [vmem:[#allocation11_spill] sm:$0xff] %v4643_v59 }
 0x157   : > { %v3316_v10 = vpop.f32.mrf.mxu1  ;;  %v4645_v35 = vpop.f32.mrf.mxu0 }
 0x158   : > { %4901 = vst [vmem:[#allocation12_spill] sm:$0xff] %v4645_v35 }
 0x159   : > { %v4647_v30 = vpop.f32.mrf.mxu1  ;;  %v4649_v54 = vpop.f32.mrf.mxu0 }
 0x15a   : > { %4902 = vst [vmem:[#allocation13_spill] sm:$0xff] %v4649_v54  ;;  %v1162_v54 = vadd.f32 %v3276_v28, %v4558_v39 }
 0x15b   : > { %v4651_v7 = vpop.f32.mrf.mxu1  ;;  %v4653_v15 = vpop.f32.mrf.mxu0 }
 0x15c   : > { %4903 = vst [vmem:[#allocation14_spill] sm:$0xff] %v4651_v7  ;;  %4904 = vst [vmem:[#allocation15_spill] sm:$0xff] %v4653_v15 }
 0x15d   : > { %v4655_v46 = vpop.f32.mrf.mxu1  ;;  %v4657_v50 = vpop.f32.mrf.mxu0 }
 0x15e   : > { %4905 = vst [vmem:[#allocation16_spill] sm:$0xff] %v4655_v46  ;;  %4906 = vst [vmem:[#allocation17_spill] sm:$0xff] %v4657_v50  ;;  %v1160_v50 = vadd.f32 %v1097_v42, %v4560_v18  ;;  %v1164_v18 = vadd.f32 %v1113_v51, %v4568_v58  ;;  %v1168_v51 = vadd.f32 %v4613_v14, %v4576_v12 }
 0x15f   : > { %v4659_v22 = vpop.f32.mrf.mxu1  ;;  %v4661_v57 = vpop.f32.mrf.mxu0  ;;  %v1172_v12 = vadd.f32 %v4629_v36, %v4586_v3 }
 0x160   : > { %4907 = vst [vmem:[#allocation18_spill] sm:$0xff] %v4659_v22  ;;  %4908 = vst [vmem:[#allocation19_spill] sm:$0xff] %v4661_v57  ;;  %v1544_v57 = vadd.f32 %v4584_v61, %v1162_v54  ;;  %v1542_v28 = vadd.f32 %v4588_v53, %v1160_v50  ;;  %v1550_v3 = vadd.f32 %v4609_v31, %v1168_v51 }
 0x161   : > { %v4663_v59 = vpop.f32.mrf.mxu1  ;;  %v4665_v60 = vpop.f32.mrf.mxu0  ;;  %v4736_v31 = vadd.f32 %v4623_v29, %v1172_v12 }
 0x162   : > { %4909 = vst [vmem:[#allocation20_spill] sm:$0xff] %v4663_v59  ;;  %4910 = vst [vmem:[#allocation21_spill] sm:$0xff] %v4665_v60  ;;  %v1163_v60 = vadd.f32 %v3277_v11, %v4562_v2  ;;  %v1798_v42 = vadd.f32 %v3312_v5, %v1544_v57  ;;  %v1796_v11 = vadd.f32 %v1733_v47, %v1542_v28 }
 0x163   : > { %v4667_v35 = vpop.f32.mrf.mxu1  ;;  %v4669_v17 = vpop.f32.mrf.mxu0 }
 0x164   : > { %4911 = vst [vmem:[#allocation22_spill] sm:$0xff] %v4667_v35  ;;  %4912 = vst [vmem:[#allocation23_spill] sm:$0xff] %v4669_v17  ;;  %v1161_v35 = vadd.f32 %v1100_v19, %v4564_v27  ;;  %v1166_v17 = vadd.f32 %v3280_v32, %v4566_v25  ;;  %v1545_v2 = vadd.f32 %v4593_v0, %v1163_v60 }
 0x165   : > { %v4672_v7 = vpop.f32.mrf.mxu1  ;;  %v4674_v15 = vpop.f32.mrf.mxu0  ;;  %v1165_v27 = vadd.f32 %v1116_v49, %v4572_v20  ;;  %v1170_v32 = vadd.f32 %v3284_v9, %v4574_v45  ;;  %v1169_v45 = vadd.f32 %v4621_v16, %v4580_v62  ;;  %v1998_v14 = vadd.f32 %v1935_v4, %v1796_v11 }
 0x166   : > { %4913 = vst [vmem:[#allocation24_spill] sm:$0xff] %v4674_v15  ;;  %v1167_v15 = vadd.f32 %v3281_v63, %v4570_v40  ;;  %v1543_v25 = vadd.f32 %v4597_v55, %v1161_v35  ;;  %v1548_v19 = vadd.f32 %v4599_v24, %v1166_v17  ;;  %v1546_v40 = vadd.f32 %v4601_v48, %v1164_v18  ;;  %v4919_v18 = vld [vmem:[#allocation11_spill] sm:$0xff] }
 0x167   : > { %v4677_v46 = vpop.f32.mrf.mxu1  ;;  %v4679_v22 = vpop.f32.mrf.mxu0  ;;  %v2000_v63 = vadd.f32 %v3330_v38, %v1798_v42  ;;  %v1799_v0 = vadd.f32 %v3313_v21, %v1545_v2  ;;  %v1171_v55 = vadd.f32 %v4617_v41, %v4578_v56  ;;  %v1174_v24 = vadd.f32 %v4625_v34, %v4582_v1  ;;  %v4721_v1 = vld [vmem:[%s4886_s2] ss:$0 sm:$0xff] }
 0x168   : > { %4914 = vst [vmem:[#allocation25_spill] sm:$0xff] %v4679_v22  ;;  %v1549_v20 = vadd.f32 %v4603_v23, %v1167_v15  ;;  %v1547_v48 = vadd.f32 %v4605_v6, %v1165_v27  ;;  %v1552_v23 = vadd.f32 %v4607_v26, %v1170_v32  ;;  %v1175_v56 = vadd.f32 %v4633_v13, %v4590_v44  ;;  %v4921_v27 = vld [vmem:[#allocation18_spill] sm:$0xff] }
 0x169   : > { %v4685_v59 = vpop.f32.mrf.mxu1  ;;  %v4687_v39 = vpop.f32.mrf.mxu0  ;;  %v1797_v62 = vadd.f32 %v1736_v43, %v1543_v25  ;;  %v1802_v41 = vadd.f32 %v3316_v10, %v1548_v19  ;;  %v2001_v34 = vadd.f32 %v4637_v52, %v1799_v0  ;;  %v1553_v26 = vadd.f32 %v4611_v37, %v1171_v55  ;;  %v4915_v37 = vld [vmem:[#allocation6_spill] sm:$0xff] }
 0x16a   : > { %v4727_v50 = vadd.f32 %v4615_v33, %v1169_v45  ;;  %v4730_v44 = vadd.f32 %v4619_v8, %v1174_v24  ;;  %v1800_v13 = vadd.f32 %v4647_v30, %v1546_v40  ;;  %v4740_v21 = vadd.f32 %v4915_v37, %v1175_v56  ;;  %v4916_v33 = vld [vmem:[#allocation9_spill] sm:$0xff]  ;;  %v4917_v8 = vld [vmem:[#allocation10_spill] sm:$0xff] }
 0x16b   : > { %v4692_v22 = vpop.f32.mrf.mxu1  ;;  %v3366_v61 = vpop.f32.mrf.mxu0  ;;  %v1999_v57 = vadd.f32 %v4916_v33, %v1797_v62  ;;  %v2004_v43 = vadd.f32 %v4917_v8, %v1802_v41  ;;  %v4918_v10 = vld [vmem:[#allocation14_spill] sm:$0xff]  ;;  %v1806_v11 = vadd.f32 %v4921_v27, %v1552_v23  ;;  %v4925_v23 = vld [vmem:[#allocation8_spill] sm:$0xff]  ;;  %v4926_v62 = vld [vmem:[#allocation13_spill] sm:$0xff] }
 0x16c   : > { %v1803_v35 = vadd.f32 %v4918_v10, %v1549_v20  ;;  %v2002_v42 = vadd.f32 %v4919_v18, %v1800_v13  ;;  %v4923_v20 = vld [vmem:[#allocation20_spill] sm:$0xff] }
 0x16d   : > { %v4699_v53 = vpop.f32.mrf.mxu1  ;;  %v2571_v58 = vpop.f32.mrf.mxu0  ;;  %v1804_v55 = vadd.f32 %v4923_v20, %v1550_v3 }
 0x16f   : > { %v3348_v49 = vpop.f32.mrf.mxu1  ;;  %v3367_v9 = vpop.f32.mrf.mxu0 }
 0x170   : > { %v2382_v17 = vadd.f32 %v3348_v49, %v2000_v63  ;;  %v4922_v63 = vld [vmem:[#allocation12_spill] sm:$0xff] }
 0x171   : > { %v2317_v6 = vpop.f32.mrf.mxu1  ;;  %v2574_v16 = vpop.f32.mrf.mxu0  ;;  %v2005_v0 = vadd.f32 %v4922_v63, %v1803_v35 }
 0x172   : > { %v2636_v36 = vadd.f32 %v3366_v61, %v2382_v17  ;;  %v2380_v38 = vadd.f32 %v2317_v6, %v1998_v14  ;;  %v4920_v61 = vld [vmem:[#allocation16_spill] sm:$0xff]  ;;  %v4924_v17 = vld [vmem:[#allocation5_spill] sm:$0xff] }
 0x173   : > { %v3349_v4 = vpop.f32.mrf.mxu1  ;;  %v3370_v5 = vpop.f32.mrf.mxu0  ;;  %v1801_v2 = vadd.f32 %v4920_v61, %v1547_v48  ;;  %v1173_v56 = vadd.f32 %v4925_v23, %v4924_v17 }
 0x174   : > { %v2659_v52 = vadd.f32 %v4721_v1, %v2636_v36  ;;  %v2634_v47 = vadd.f32 %v2571_v58, %v2380_v38  ;;  %v2383_v60 = vadd.f32 %v3349_v4, %v2001_v34  ;;  %v4927_v36 = vld [vmem:[#allocation15_spill] sm:$0xff] }
 0x175   : > { %v2320_v30 = vpop.f32.mrf.mxu1  ;;  %v2587_v54 = vpop.f32.mrf.mxu0  ;;  %v2003_v41 = vadd.f32 %v4926_v62, %v1801_v2  ;;  %v2008_v38 = vadd.f32 %v4927_v36, %v1806_v11  ;;  %v4930_v2 = vld [vmem:[#allocation19_spill] sm:$0xff]  ;;  %v1810_v11 = vadd.f32 %v4677_v46, %v4730_v44  ;;  %v1811_v62 = vadd.f32 %v4692_v22, %v4740_v21 }
 0x176   : > { %vm2675_vm9 = vcmp.ge.f32.partialorder %v2659_v52, 0.0  ;;  %v2691_v15 = vmul.f32 0.1, %v2659_v52  ;;  %v2657_v29 = vadd.f32 %v4721_v1, %v2634_v47  ;;  %v2637_v28 = vadd.f32 %v3367_v9, %v2383_v60  ;;  %v4928_v47 = vld [vmem:[#allocation22_spill] sm:$0xff] }
 0x177   : > { %v2381_v25 = vadd.f32 %v2320_v30, %v1999_v57  ;;  %v3352_v19 = vpop.f32.mrf.mxu1  ;;  %v3371_v32 = vpop.f32.mrf.mxu0  ;;  %v1807_v60 = vadd.f32 %v4928_v47, %v1553_v26 }
 0x178   : > { %v2707_v58 = vsel %vm2675_vm9, %v2659_v52, %v2691_v15  ;;  %vm2673_vm10 = vcmp.ge.f32.partialorder %v2657_v29, 0.0  ;;  %v2689_v40 = vmul.f32 0.1, %v2657_v29  ;;  %v2660_v51 = vadd.f32 %v4721_v1, %v2637_v28 }
 0x179   : > { %2724 = vst.msk [vmem:[%s4752_s5 + $0x10] sm:$0xff] %vm2721_vm8, %v2707_v58  ;;  %v2635_v45 = vadd.f32 %v2574_v16, %v2381_v25  ;;  %v2386_v24 = vadd.f32 %v3352_v19, %v2004_v43  ;;  %v2333_v49 = vpop.f32.mrf.mxu1  ;;  %v2590_v9 = vpop.f32.mrf.mxu0  ;;  %v4929_v43 = vld [vmem:[#allocation17_spill] sm:$0xff]  ;;  %v2009_v27 = vadd.f32 %v4930_v2, %v1807_v60 }
 0x17a   : > { %v2705_v48 = vsel %vm2673_vm10, %v2657_v29, %v2689_v40  ;;  %vm2676_vm11 = vcmp.ge.f32.partialorder %v2660_v51, 0.0  ;;  %v2692_v12 = vmul.f32 0.1, %v2660_v51  ;;  %v2384_v14 = vadd.f32 %v2333_v49, %v2002_v42 }
 0x17b   : > { %2722 = vst.msk [vmem:[%s4752_s5] sm:$0xff] %vm2721_vm8, %v2705_v48  ;;  %v2658_v6 = vadd.f32 %v4721_v1, %v2635_v45  ;;  %v2640_v3 = vadd.f32 %v3370_v5, %v2386_v24  ;;  %v3353_v34 = vpop.f32.mrf.mxu1  ;;  %v3374_v16 = vpop.f32.mrf.mxu0  ;;  %v2006_v5 = vadd.f32 %v4929_v43, %v1804_v55  ;;  %v4933_v48 = vld [vmem:[#allocation23_spill] sm:$0xff] }
 0x17c   : > { %v2708_v13 = vsel %vm2676_vm11, %v2660_v51, %v2692_v12  ;;  %v2638_v4 = vadd.f32 %v2587_v54, %v2384_v14  ;;  %v2387_v52 = vadd.f32 %v3353_v34, %v2005_v0  ;;  %v1805_v54 = vadd.f32 %v4672_v7, %v4727_v50  ;;  %v4931_v51 = vld [vmem:[#allocation7_spill] sm:$0xff]  ;;  %v4932_v0 = vld [vmem:[#allocation21_spill] sm:$0xff] }
 0x17d   : > { %2725 = vst.msk [vmem:[%s4752_s5 + $0x18] sm:$0xff] %vm2721_vm8, %v2708_v13  ;;  %vm2674_vm12 = vcmp.ge.f32.partialorder %v2658_v6, 0.0  ;;  %v2690_v37 = vmul.f32 0.1, %v2658_v6  ;;  %v2663_v33 = vadd.f32 %v4721_v1, %v2640_v3  ;;  %v2336_v57 = vpop.f32.mrf.mxu1  ;;  %v2603_v8 = vpop.f32.mrf.mxu0  ;;  %v1555_v63 = vadd.f32 %v4931_v51, %v1173_v56 }
 0x17e   : > { %v2661_v10 = vadd.f32 %v4721_v1, %v2638_v4  ;;  %v2641_v35 = vadd.f32 %v3371_v32, %v2387_v52  ;;  %v2385_v30 = vadd.f32 %v2336_v57, %v2003_v41  ;;  %v2007_v20 = vadd.f32 %v4932_v0, %v1805_v54  ;;  %v4934_v52 = vld [vmem:[#allocation24_spill] sm:$0xff]  ;;  %v4935_v57 = vld [vmem:[#allocation25_spill] sm:$0xff] }
 0x17f   : > { %v2706_v15 = vsel %vm2674_vm12, %v2658_v6, %v2690_v37  ;;  %vm2679_vm13 = vcmp.ge.f32.partialorder %v2663_v33, 0.0  ;;  %v2695_v26 = vmul.f32 0.1, %v2663_v33  ;;  %v3356_v29 = vpop.f32.mrf.mxu1  ;;  %v3375_v28 = vpop.f32.mrf.mxu0  ;;  %v2012_v12 = vadd.f32 %v4933_v48, %v1810_v11 }
 0x180   : > { %2723 = vst.msk [vmem:[%s4752_s5 + $0x8] sm:$0xff] %vm2721_vm8, %v2706_v15  ;;  %vm2677_vm14 = vcmp.ge.f32.partialorder %v2661_v10, 0.0  ;;  %v2693_v18 = vmul.f32 0.1, %v2661_v10  ;;  %v2664_v42 = vadd.f32 %v4721_v1, %v2641_v35  ;;  %v2639_v61 = vadd.f32 %v2590_v9, %v2385_v30 }
 0x181   : > { %v2711_v7 = vsel %vm2679_vm13, %v2663_v33, %v2695_v26  ;;  %v2390_v50 = vadd.f32 %v3356_v29, %v2008_v38  ;;  %v2349_v25 = vpop.f32.mrf.mxu1  ;;  %v2606_v19 = vpop.f32.mrf.mxu0  ;;  %v1808_v14 = vadd.f32 %v4685_v59, %v4736_v31  ;;  %v1809_v34 = vadd.f32 %v4699_v53, %v1555_v63 }
 0x182   : > { %2728 = vst.msk [vmem:[%s4752_s5 + $0x30] sm:$0xff] %vm2721_vm8, %v2711_v7  ;;  %v2709_v32 = vsel %vm2677_vm14, %v2661_v10, %v2693_v18  ;;  %vm2680_vm15 = vcmp.ge.f32.partialorder %v2664_v42, 0.0  ;;  %v2696_v58 = vmul.f32 0.1, %v2664_v42  ;;  %v2662_v40 = vadd.f32 %v4721_v1, %v2639_v61 }
 0x183   : > { %2726 = vst.msk [vmem:[%s4752_s5 + $0x20] sm:$0xff] %vm2721_vm8, %v2709_v32  ;;  %v2644_v55 = vadd.f32 %v3374_v16, %v2390_v50  ;;  %v2388_v46 = vadd.f32 %v2349_v25, %v2006_v5  ;;  %v3357_v44 = vpop.f32.mrf.mxu1  ;;  %v3378_v45 = vpop.f32.mrf.mxu0  ;;  %v2010_v22 = vadd.f32 %v4934_v52, %v1808_v14  ;;  %v2011_v43 = vadd.f32 %v4687_v39, %v1809_v34 }
 0x184   : > { %v2712_v24 = vsel %vm2680_vm15, %v2664_v42, %v2696_v58  ;;  %vm2678_vm0 = vcmp.ge.f32.partialorder %v2662_v40, 0.0  ;;  %v2694_v49 = vmul.f32 0.1, %v2662_v40  ;;  %v2391_v9 = vadd.f32 %v3357_v44, %v2009_v27 }
 0x185   : > { %2729 = vst.msk [vmem:[%s4752_s5 + $0x38] sm:$0xff] %vm2721_vm8, %v2712_v24  ;;  %v2667_v17 = vadd.f32 %v4721_v1, %v2644_v55  ;;  %v2642_v23 = vadd.f32 %v2603_v8, %v2388_v46  ;;  %v2352_v56 = vpop.f32.mrf.mxu1  ;;  %v2619_v36 = vpop.f32.mrf.mxu0  ;;  %v2013_v8 = vadd.f32 %v4935_v57, %v1811_v62 }
 0x186   : > { %v2710_v41 = vsel %vm2678_vm0, %v2662_v40, %v2694_v49  ;;  %v2645_v6 = vadd.f32 %v3375_v28, %v2391_v9  ;;  %v2389_v3 = vadd.f32 %v2352_v56, %v2007_v20 }
 0x187   : > { %2727 = vst.msk [vmem:[%s4752_s5 + $0x28] sm:$0xff] %vm2721_vm8, %v2710_v41  ;;  %vm2683_vm1 = vcmp.ge.f32.partialorder %v2667_v17, 0.0  ;;  %v2699_v16 = vmul.f32 0.1, %v2667_v17  ;;  %v2665_v59 = vadd.f32 %v4721_v1, %v2642_v23  ;;  %v3360_v31 = vpop.f32.mrf.mxu1  ;;  %v3379_v30 = vpop.f32.mrf.mxu0 }
 0x188   : > { %v2668_v38 = vadd.f32 %v4721_v1, %v2645_v6  ;;  %v2643_v13 = vadd.f32 %v2606_v19, %v2389_v3  ;;  %v2394_v4 = vadd.f32 %v3360_v31, %v2012_v12 }
 0x189   : > { %v2715_v21 = vsel %vm2683_vm1, %v2667_v17, %v2699_v16  ;;  %vm2681_vm2 = vcmp.ge.f32.partialorder %v2665_v59, 0.0  ;;  %v2697_v53 = vmul.f32 0.1, %v2665_v59  ;;  %v2365_v47 = vpop.f32.mrf.mxu1  ;;  %v2622_v11 = vpop.f32.mrf.mxu0 }
 0x18a   : > { %2732 = vst.msk [vmem:[%s4752_s5 + $0x50] sm:$0xff] %vm2721_vm8, %v2715_v21  ;;  %vm2684_vm3 = vcmp.ge.f32.partialorder %v2668_v38, 0.0  ;;  %v2700_v60 = vmul.f32 0.1, %v2668_v38  ;;  %v2666_v37 = vadd.f32 %v4721_v1, %v2643_v13  ;;  %v2648_v33 = vadd.f32 %v3378_v45, %v2394_v4 }
 0x18b   : > { %v2713_v5 = vsel %vm2681_vm2, %v2665_v59, %v2697_v53  ;;  %v2392_v10 = vadd.f32 %v2365_v47, %v2010_v22  ;;  %v3361_v35 = vpop.f32.mrf.mxu1 }
 0x18c   : > { %2730 = vst.msk [vmem:[%s4752_s5 + $0x40] sm:$0xff] %vm2721_vm8, %v2713_v5  ;;  %v2716_v54 = vsel %vm2684_vm3, %v2668_v38, %v2700_v60  ;;  %vm2682_vm4 = vcmp.ge.f32.partialorder %v2666_v37, 0.0  ;;  %v2698_v15 = vmul.f32 0.1, %v2666_v37  ;;  %v2671_v26 = vadd.f32 %v4721_v1, %v2648_v33 }
 0x18d   : > { %2733 = vst.msk [vmem:[%s4752_s5 + $0x58] sm:$0xff] %vm2721_vm8, %v2716_v54  ;;  %v2646_v29 = vadd.f32 %v2619_v36, %v2392_v10  ;;  %v2395_v28 = vadd.f32 %v3361_v35, %v2013_v8  ;;  %v2368_v39 = vpop.f32.mrf.mxu1 }
 0x18e   : > { %v2714_v18 = vsel %vm2682_vm4, %v2666_v37, %v2698_v15  ;;  %vm2687_vm5 = vcmp.ge.f32.partialorder %v2671_v26, 0.0  ;;  %v2703_v42 = vmul.f32 0.1, %v2671_v26  ;;  %v2393_v61 = vadd.f32 %v2368_v39, %v2011_v43 }
 0x18f   : > { %2731 = vst.msk [vmem:[%s4752_s5 + $0x48] sm:$0xff] %vm2721_vm8, %v2714_v18  ;;  %v2669_v2 = vadd.f32 %v4721_v1, %v2646_v29  ;;  %v2649_v27 = vadd.f32 %v3379_v30, %v2395_v28 }
 0x190   : > { %v2719_v7 = vsel %vm2687_vm5, %v2671_v26, %v2703_v42  ;;  %v2647_v50 = vadd.f32 %v2622_v11, %v2393_v61 }
 0x191   : > { %2736 = vst.msk [vmem:[%s4752_s5 + $0x70] sm:$0xff] %vm2721_vm8, %v2719_v7  ;;  %vm2685_vm6 = vcmp.ge.f32.partialorder %v2669_v2, 0.0  ;;  %v2701_v25 = vmul.f32 0.1, %v2669_v2  ;;  %v2672_v19 = vadd.f32 %v4721_v1, %v2649_v27 }
 0x192   : > { %v2670_v32 = vadd.f32 %v4721_v1, %v2647_v50 }
 0x193   : > { %v2717_v58 = vsel %vm2685_vm6, %v2669_v2, %v2701_v25  ;;  %vm2688_vm7 = vcmp.ge.f32.partialorder %v2672_v19, 0.0  ;;  %v2704_v40 = vmul.f32 0.1, %v2672_v19 }
 0x194   : > { %2734 = vst.msk [vmem:[%s4752_s5 + $0x60] sm:$0xff] %vm2721_vm8, %v2717_v58  ;;  %vm2686_vm9 = vcmp.ge.f32.partialorder %v2670_v32, 0.0  ;;  %v2702_v51 = vmul.f32 0.1, %v2670_v32 }
 0x195   : > { %v2720_v63 = vsel %vm2688_vm7, %v2672_v19, %v2704_v40 }
 0x196   : > { %2737 = vst.msk [vmem:[%s4752_s5 + $0x78] sm:$0xff] %vm2721_vm8, %v2720_v63  ;;  %v2718_v1 = vsel %vm2686_vm9, %v2670_v32, %v2702_v51 }
 0x197   : > { %2735 = vst.msk [vmem:[%s4752_s5 + $0x68] sm:$0xff] %vm2721_vm8, %v2718_v1 }
 0x198   : > { %3503 = shalt.err (!%p3500_p6)
}
 0x199   : > { %s3504_s27 = scalar_lea.hbm %s4823_s11, 2048  ;;  %s3508_s6 = scalar_lea.hbm %s4887_s3, 8192 }
 0x19a   : > { %p3505_p7 = scmp.ne.s32.totalorder %s4823_s11, %s3504_s27  ;;  %p3509_p11 = scmp.lt.s32.totalorder %s4823_s11, %s4887_s3 }
 0x19b   : > { %p3510_p12 = scmp.lt.s32.totalorder %s3508_s6, %s3504_s27 }
 0x19c   : > { %p3506_p9 = pnand %p3505_p7, %p3658_p3 }
 0x19d   : > { %p3511_p13 = por %p3510_p12, %p3509_p11 }
 0x19e   : > { %p3507_p10 = pneg %p3506_p9 }
 0x1a0   : > { %p3512_p0 = pnand %p3511_p13, %p3507_p10 }
 0x1a2   : > { %3515 = shalt.err (!%p3512_p0)
}
 0x1a3   : > { %s3585_s16 = smov 128   ;;  %s3586_s9 = smov 8  }
 0x1a4   : > { %3393 = dma.vmem_to_hbm [thread:$0]  (%p3658_p3), %s4825_s8, 2048, %s4823_s11, %s4833_s20, %s3585_s16, %s3585_s16, %s3586_s9  }
 0x1a5 PF: > { %p3399_p1 = scmp.ge.s32.totalorder %s3582_s19, 2  ;;  %s2770_s10 = sand.u32 1, %s3554_s12  }
 0x1a6   : > { %s2771_s21 = scalar_lea.sflag [#allocation3], %s2770_s10 }
 0x1a7   : > { %p3396_p2 = pnand %p3399_p1, %p3667_p8 }
 0x1a9   : > { %p3397_p4 = pneg %p3396_p2 }
 0x1ab   : > { %3549 = dma.done.wait (%p3397_p4), %s2771_s21, 2048  }
 0x1ac   : > { %3551 = vsyncadd (%p3397_p4), %s2771_s21, 4294965248  ;;  %s16_s19 = sadd.s32 1, %s3582_s19   ;;  %s4936_s12 = smov %s3558_s13 }
 0x1ad   : > { %p13_p5 = scmp.ge.s32.totalorder %s16_s19, 6   ;;  %s4937_s13 = smov %s3562_s14 }
 0x1ae   : > { %s4938_s14 = smov %s3676_s30  ;;  %s4939_s15 = smov %s3574_s17 }
 0x1af   : > { %s4940_s16 = smov %s3578_s18  ;;  %s4941_s17 = smov %s4944_s22 }
 0x1b0   : > { %s4942_s18 = smov %s4948_s23  ;;  %15 = sbr.rel (!%p13_p5) target bundleno = 5 (0x5), region = 78 }
 0x1b5   :  { %2776 = vsyncpa [#allocation3], 1 }
 0x1b6   :  { %2778 = vsyncpa [#allocation3 + $0x1], 1 }

</bundles_post_ra>
